<compile_context>
chip_gen: v7x
topology: tpu7x:2x2x1
jax: 0.10.0
libtpu: 0.0.40
codegen_flags: <defaults>
</compile_context>

<pallas_src>
import functools

import jax
import jax.numpy as jnp
from jax import lax
from jax.experimental import pallas as pl
from jax.experimental.pallas import tpu as pltpu


# ----------------------------------------------------------------------------
# Stage 1: H = relu((A @ X) @ W_comb + rowsum(A)[:,None] * b_comb + b_g)
# ----------------------------------------------------------------------------
def gcn_kernel(adj_ref, x_ref, wc_ref, bc_ref, bg_ref, h_ref, acc_ref, rs_ref):
    k = pl.program_id(1)

    @pl.when(k == 0)
    def _():
        acc_ref[...] = jnp.zeros_like(acc_ref)
        rs_ref[...] = jnp.zeros_like(rs_ref)

    # Adjacency is stored in bf16 (0/1 values are exact); lift to f32 so the
    # message-passing matmul is computed exactly in f32.
    a = adj_ref[...].astype(jnp.float32)                       # [TM, TK]
    acc_ref[...] += jnp.dot(a, x_ref[...],
                            preferred_element_type=jnp.float32)  # [TM, F_in]
    rs_ref[...] += jnp.sum(a, axis=1, keepdims=True)             # [TM, 1]

    @pl.when(k == pl.num_programs(1) - 1)
    def _():
        h = jnp.dot(acc_ref[...], wc_ref[...],
                    preferred_element_type=jnp.float32)          # [TM, H]
        h = h + rs_ref[...] * bc_ref[...] + bg_ref[...]
        h_ref[...] = jnp.maximum(h, 0.0).astype(h_ref.dtype)     # bf16 out


# ----------------------------------------------------------------------------
# Stage 2: preds_tile = sigmoid(H_i @ H_j^T)   (contraction over hidden dim)
# ----------------------------------------------------------------------------
def preds_kernel(h_row_ref, h_col_ref, preds_ref):
    # dot_general with contracted last dims on both operands: feeds the MXU in
    # natural [rows, H] layout, no XLU transpose of H.
    dot = lax.dot_general(
        h_row_ref[...], h_col_ref[...],
        dimension_numbers=(((1,), (1,)), ((), ())),
        preferred_element_type=jnp.float32)                      # [TM, TN]
    preds_ref[...] = jax.nn.sigmoid(dot)


def _pick_tile(n, preferred):
    return preferred if n % preferred == 0 else n


@functools.partial(jax.jit, static_argnames=("tm", "tn", "tk"))
def gae_forward(sentences, adj, w_sent, b_sent, w_graph, b_graph,
                *, tm=128, tn=128, tk=128):
    n, f_in = sentences.shape
    hidden = w_graph.shape[1]

    tm = _pick_tile(n, tm)
    tn = _pick_tile(n, tn)
    tk = _pick_tile(n, tk)

    # Host-side algebraic fold of the two parameter matmuls (f32).
    w_comb = jnp.dot(w_sent, w_graph,
                     preferred_element_type=jnp.float32)         # [F_in, H]
    b_comb = jnp.dot(b_sent, w_graph,
                     preferred_element_type=jnp.float32)         # [1, H]

    adj_bf16 = adj.astype(jnp.bfloat16)                          # exact for 0/1
    x = sentences.astype(jnp.float32)

    # ---- Stage 1: H (N x hidden), bf16 ----
    h = pl.pallas_call(
        gcn_kernel,
        out_shape=jax.ShapeDtypeStruct((n, hidden), jnp.bfloat16),
        grid_spec=pltpu.PrefetchScalarGridSpec(
            num_scalar_prefetch=0,
            grid=(n // tm, n // tk),
            in_specs=[
                pl.BlockSpec((tm, tk), lambda i, k: (i, k)),       # adj rows
                pl.BlockSpec((tk, f_in), lambda i, k: (k, 0)),     # X
                pl.BlockSpec((f_in, hidden), lambda i, k: (0, 0)),  # W_comb
                pl.BlockSpec((1, hidden), lambda i, k: (0, 0)),     # b_comb
                pl.BlockSpec((1, hidden), lambda i, k: (0, 0)),     # b_g
            ],
            out_specs=pl.BlockSpec((tm, hidden), lambda i, k: (i, 0)),
            scratch_shapes=[
                pltpu.VMEM((tm, f_in), jnp.float32),   # A@X accumulator
                pltpu.VMEM((tm, 1), jnp.float32),      # rowsum(A) accumulator
            ],
        ),
        compiler_params=pltpu.CompilerParams(
            dimension_semantics=("parallel", "arbitrary"),
            vmem_limit_bytes=48 * 1024 * 1024),
    )(adj_bf16, x, w_comb, b_comb, b_graph)

    # ---- Stage 2: preds = sigmoid(H @ H^T), tiled lane-dense output ----
    preds = pl.pallas_call(
        preds_kernel,
        out_shape=jax.ShapeDtypeStruct((n, n), jnp.float32),
        grid_spec=pltpu.PrefetchScalarGridSpec(
            num_scalar_prefetch=0,
            grid=(n // tm, n // tn),
            in_specs=[
                pl.BlockSpec((tm, hidden), lambda i, j: (i, 0)),   # H row tile
                pl.BlockSpec((tn, hidden), lambda i, j: (j, 0)),   # H col tile
            ],
            out_specs=pl.BlockSpec((tm, tn), lambda i, j: (i, j)),
        ),
        compiler_params=pltpu.CompilerParams(
            dimension_semantics=("parallel", "parallel"),
            vmem_limit_bytes=48 * 1024 * 1024),
    )(h, h)

    return preds


def gae_forward_ref(sentences, adj, w_sent, b_sent, w_graph, b_graph):
    # Pure-f32 reference with the original (unfolded) op order.
    sent_vecs = sentences @ w_sent + b_sent
    h = jnp.maximum(adj @ sent_vecs @ w_graph + b_graph, 0.0)
    return jax.nn.sigmoid(h @ h.T)


if __name__ == "__main__":
    # Small but lane-dense shapes (multiples of 128 so the MXU / store path
    # are exercised properly): a batched graph with N nodes, each carrying a
    # sentence-feature vector of width F_in.
    N_NODES, F_IN, F_SENT, HIDDEN = 256, 128, 128, 128

    key = jax.random.PRNGKey(0)
    k_sent, k_adj, k_ws, k_bs, k_wg, k_bg = jax.random.split(key, 6)

    sentences = jax.random.normal(k_sent, (N_NODES, F_IN), dtype=jnp.float32)
    # Dense 0/1 adjacency (like dgl adjacency_matrix().to_dense()).
    adj = (jax.random.uniform(k_adj, (N_NODES, N_NODES)) < 0.25).astype(
        jnp.float32)

    # Deterministic synthetic parameters (no checkpoint loading), scaled so
    # the similarity logits stay in a non-saturated range.
    w_sent = jax.random.normal(k_ws, (F_IN, F_SENT), dtype=jnp.float32) * 0.02
    b_sent = jax.random.normal(k_bs, (1, F_SENT), dtype=jnp.float32) * 0.01
    w_graph = jax.random.normal(k_wg, (F_SENT, HIDDEN), dtype=jnp.float32) * 0.01
    b_graph = jax.random.normal(k_bg, (1, HIDDEN), dtype=jnp.float32) * 0.01

    preds = gae_forward(sentences, adj, w_sent, b_sent, w_graph, b_graph)
    preds = jax.block_until_ready(preds)

    ref = gae_forward_ref(sentences, adj, w_sent, b_sent, w_graph, b_graph)
    assert preds.shape == (N_NODES, N_NODES)
    # Tolerance accounts for the bf16 H / bf16 adjacency storage (f32 accum).
    assert jnp.allclose(preds, ref, atol=2e-2, rtol=2e-2), (
        float(jnp.max(jnp.abs(preds - ref))))

    # TODO(synk): the weighted BCE loss / accuracy in Loss() and the training
    # loop are training-time logic, not part of forward(); not implemented.
    print("KERNEL_OK")
</pallas_src>

<mosaic_0001>
module attributes {stable_mosaic.version = 11 : i64} {
  func.func @gcn_kernel(%arg0: i32, %arg1: i32, %arg2: memref<128x128xbf16, #tpu.memory_space<vmem>>, %arg3: memref<128x128xf32, #tpu.memory_space<vmem>>, %arg4: memref<128x128xf32, #tpu.memory_space<vmem>>, %arg5: memref<1x128xf32, #tpu.memory_space<vmem>>, %arg6: memref<1x128xf32, #tpu.memory_space<vmem>>, %arg7: memref<128x128xbf16, #tpu.memory_space<vmem>>, %arg8: memref<128x128xf32, #tpu.memory_space<vmem>>, %arg9: memref<128x1xf32, #tpu.memory_space<vmem>>) attributes {dimension_semantics = [#tpu.dimension_semantics<parallel>, #tpu.dimension_semantics<arbitrary>], iteration_bounds = array<i64: 2, 2>, scalar_prefetch = 0 : i64, scratch_operands = 2 : i64, tpu.core_type = #tpu.core_type<tc>, window_params = [{transform_indices = @transform_0, window_bounds = array<i64: 128, 128>}, {transform_indices = @transform_1, window_bounds = array<i64: 128, 128>}, {pipeline_mode = #tpu.pipeline_mode<synchronous>, transform_indices = @transform_2, window_bounds = array<i64: 128, 128>}, {pipeline_mode = #tpu.pipeline_mode<synchronous>, transform_indices = @transform_3, window_bounds = array<i64: 1, 128>}, {pipeline_mode = #tpu.pipeline_mode<synchronous>, transform_indices = @transform_4, window_bounds = array<i64: 1, 128>}, {transform_indices = @transform_5, window_bounds = array<i64: 128, 128>}]} {
    %c0_i32 = arith.constant 0 : i32
    %0 = arith.cmpi eq, %arg1, %c0_i32 : i32
    %1 = arith.extui %0 : i1 to i32
    %c0_i32_0 = arith.constant 0 : i32
    %2 = arith.cmpi ne, %1, %c0_i32_0 : i32
    scf.if %2 {
      %cst_14 = arith.constant 0.000000e+00 : f32
      %18 = vector.broadcast %cst_14 : f32 to vector<128x128xf32>
      %c0_15 = arith.constant 0 : index
      %c0_16 = arith.constant 0 : index
      %19 = vector.load %arg8[%c0_15, %c0_16] : memref<128x128xf32, #tpu.memory_space<vmem>>, vector<128x128xf32>
      tpu.vector_store %arg8[%c0_15, %c0_16], %18 {strides = array<i32>} : memref<128x128xf32, #tpu.memory_space<vmem>>, vector<128x128xf32>,
      %cst_17 = arith.constant 0.000000e+00 : f32
      %20 = vector.broadcast %cst_17 : f32 to vector<128x1xf32>
      %c0_18 = arith.constant 0 : index
      %c0_19 = arith.constant 0 : index
      %21 = vector.load %arg9[%c0_18, %c0_19] : memref<128x1xf32, #tpu.memory_space<vmem>>, vector<128x1xf32>
      tpu.vector_store %arg9[%c0_18, %c0_19], %20 {strides = array<i32>} : memref<128x1xf32, #tpu.memory_space<vmem>>, vector<128x1xf32>,
    } else {
    }
    %c0 = arith.constant 0 : index
    %c0_1 = arith.constant 0 : index
    %3 = vector.load %arg2[%c0, %c0_1] : memref<128x128xbf16, #tpu.memory_space<vmem>>, vector<128x128xbf16>
    %4 = arith.extf %3 : vector<128x128xbf16> to vector<128x128xf32>
    %c0_2 = arith.constant 0 : index
    %c0_3 = arith.constant 0 : index
    %5 = vector.load %arg8[%c0_2, %c0_3] : memref<128x128xf32, #tpu.memory_space<vmem>>, vector<128x128xf32>
    %c0_4 = arith.constant 0 : index
    %c0_5 = arith.constant 0 : index
    %6 = vector.load %arg3[%c0_4, %c0_5] : memref<128x128xf32, #tpu.memory_space<vmem>>, vector<128x128xf32>
    %cst = arith.constant dense<0.000000e+00> : vector<128x128xf32>
    %7 = tpu.matmul %4, %6, %cst {dimension_numbers = #tpu.dot_dimension_numbers<[1], [0], [0], [1], [0, 0, 1, 1], [], []>} : vector<128x128xf32>, vector<128x128xf32>, vector<128x128xf32> -> vector<128x128xf32>
    %8 = arith.addf %5, %7 : vector<128x128xf32>
    %c0_6 = arith.constant 0 : index
    %c0_7 = arith.constant 0 : index
    %9 = vector.load %arg8[%c0_6, %c0_7] : memref<128x128xf32, #tpu.memory_space<vmem>>, vector<128x128xf32>
    tpu.vector_store %arg8[%c0_6, %c0_7], %8 {strides = array<i32>} : memref<128x128xf32, #tpu.memory_space<vmem>>, vector<128x128xf32>,
    %c0_8 = arith.constant 0 : index
    %c0_9 = arith.constant 0 : index
    %10 = vector.load %arg9[%c0_8, %c0_9] : memref<128x1xf32, #tpu.memory_space<vmem>>, vector<128x1xf32>
    %cst_10 = arith.constant dense<0.000000e+00> : vector<128xf32>
    %11 = vector.multi_reduction <add>, %4, %cst_10 [1] : vector<128x128xf32> to vector<128xf32>
    %12 = vector.shape_cast %11 : vector<128xf32> to vector<128x1xf32>
    %13 = arith.addf %10, %12 : vector<128x1xf32>
    %c0_11 = arith.constant 0 : index
    %c0_12 = arith.constant 0 : index
    %14 = vector.load %arg9[%c0_11, %c0_12] : memref<128x1xf32, #tpu.memory_space<vmem>>, vector<128x1xf32>
    tpu.vector_store %arg9[%c0_11, %c0_12], %13 {strides = array<i32>} : memref<128x1xf32, #tpu.memory_space<vmem>>, vector<128x1xf32>,
    %c1_i32 = arith.constant 1 : i32
    %15 = arith.cmpi eq, %arg1, %c1_i32 : i32
    %16 = arith.extui %15 : i1 to i32
    %c0_i32_13 = arith.constant 0 : i32
    %17 = arith.cmpi ne, %16, %c0_i32_13 : i32
    scf.if %17 {
      %c0_14 = arith.constant 0 : index
      %c0_15 = arith.constant 0 : index
      %18 = vector.load %arg8[%c0_14, %c0_15] : memref<128x128xf32, #tpu.memory_space<vmem>>, vector<128x128xf32>
      %c0_16 = arith.constant 0 : index
      %c0_17 = arith.constant 0 : index
      %19 = vector.load %arg4[%c0_16, %c0_17] : memref<128x128xf32, #tpu.memory_space<vmem>>, vector<128x128xf32>
      %cst_18 = arith.constant dense<0.000000e+00> : vector<128x128xf32>
      %20 = tpu.matmul %18, %19, %cst_18 {dimension_numbers = #tpu.dot_dimension_numbers<[1], [0], [0], [1], [0, 0, 1, 1], [], []>} : vector<128x128xf32>, vector<128x128xf32>, vector<128x128xf32> -> vector<128x128xf32>
      %c0_19 = arith.constant 0 : index
      %c0_20 = arith.constant 0 : index
      %21 = vector.load %arg9[%c0_19, %c0_20] : memref<128x1xf32, #tpu.memory_space<vmem>>, vector<128x1xf32>
      %c0_21 = arith.constant 0 : index
      %c0_22 = arith.constant 0 : index
      %22 = vector.load %arg5[%c0_21, %c0_22] : memref<1x128xf32, #tpu.memory_space<vmem>>, vector<1x128xf32>
      %23 = vector.broadcast %21 : vector<128x1xf32> to vector<128x128xf32>
      %24 = vector.broadcast %22 : vector<1x128xf32> to vector<128x128xf32>
      %25 = arith.mulf %23, %24 : vector<128x128xf32>
      %26 = arith.addf %20, %25 : vector<128x128xf32>
      %c0_23 = arith.constant 0 : index
      %c0_24 = arith.constant 0 : index
      %27 = vector.load %arg6[%c0_23, %c0_24] : memref<1x128xf32, #tpu.memory_space<vmem>>, vector<1x128xf32>
      %28 = vector.broadcast %27 : vector<1x128xf32> to vector<128x128xf32>
      %29 = arith.addf %26, %28 : vector<128x128xf32>
      %cst_25 = arith.constant 0.000000e+00 : f32
      %30 = vector.broadcast %cst_25 : f32 to vector<128x128xf32>
      %31 = arith.maximumf %29, %30 : vector<128x128xf32>
      %32 = arith.truncf %31 : vector<128x128xf32> to vector<128x128xbf16>
      %c0_26 = arith.constant 0 : index
      %c0_27 = arith.constant 0 : index
      %33 = vector.load %arg7[%c0_26, %c0_27] : memref<128x128xbf16, #tpu.memory_space<vmem>>, vector<128x128xbf16>
      tpu.vector_store %arg7[%c0_26, %c0_27], %32 {strides = array<i32>} : memref<128x128xbf16, #tpu.memory_space<vmem>>, vector<128x128xbf16>,
    } else {
    }
    return
  }
  func.func @transform_0(%arg0: i32, %arg1: i32) -> (i32, i32) {
    %c0_i32 = arith.constant 0 : i32
    return %arg0, %arg1 : i32, i32
  }
  func.func @transform_1(%arg0: i32, %arg1: i32) -> (i32, i32) {
    %c0_i32 = arith.constant 0 : i32
    %c0_i32_0 = arith.constant 0 : i32
    return %arg1, %c0_i32 : i32, i32
  }
  func.func @transform_2(%arg0: i32, %arg1: i32) -> (i32, i32) {
    %c0_i32 = arith.constant 0 : i32
    %c0_i32_0 = arith.constant 0 : i32
    %c0_i32_1 = arith.constant 0 : i32
    return %c0_i32, %c0_i32_0 : i32, i32
  }
  func.func @transform_3(%arg0: i32, %arg1: i32) -> (i32, i32) {
    %c0_i32 = arith.constant 0 : i32
    %c0_i32_0 = arith.constant 0 : i32
    %c0_i32_1 = arith.constant 0 : i32
    return %c0_i32, %c0_i32_0 : i32, i32
  }
  func.func @transform_4(%arg0: i32, %arg1: i32) -> (i32, i32) {
    %c0_i32 = arith.constant 0 : i32
    %c0_i32_0 = arith.constant 0 : i32
    %c0_i32_1 = arith.constant 0 : i32
    return %c0_i32, %c0_i32_0 : i32, i32
  }
  func.func @transform_5(%arg0: i32, %arg1: i32) -> (i32, i32) {
    %c0_i32 = arith.constant 0 : i32
    %c0_i32_0 = arith.constant 0 : i32
    return %arg0, %c0_i32 : i32, i32
  }
}

module attributes {stable_mosaic.version = 11 : i64} {
  func.func @preds_kernel(%arg0: i32, %arg1: i32, %arg2: memref<128x128xbf16, #tpu.memory_space<vmem>>, %arg3: memref<128x128xbf16, #tpu.memory_space<vmem>>, %arg4: memref<128x128xf32, #tpu.memory_space<vmem>>) attributes {dimension_semantics = [#tpu.dimension_semantics<parallel>, #tpu.dimension_semantics<parallel>], iteration_bounds = array<i64: 2, 2>, scalar_prefetch = 0 : i64, scratch_operands = 0 : i64, tpu.core_type = #tpu.core_type<tc>, window_params = [{transform_indices = @transform_0, window_bounds = array<i64: 128, 128>}, {transform_indices = @transform_1, window_bounds = array<i64: 128, 128>}, {transform_indices = @transform_2, window_bounds = array<i64: 128, 128>}]} {
    %c0 = arith.constant 0 : index
    %c0_0 = arith.constant 0 : index
    %0 = vector.load %arg2[%c0, %c0_0] : memref<128x128xbf16, #tpu.memory_space<vmem>>, vector<128x128xbf16>
    %c0_1 = arith.constant 0 : index
    %c0_2 = arith.constant 0 : index
    %1 = vector.load %arg3[%c0_1, %c0_2] : memref<128x128xbf16, #tpu.memory_space<vmem>>, vector<128x128xbf16>
    %cst = arith.constant dense<0.000000e+00> : vector<128x128xf32>
    %2 = tpu.matmul %0, %1, %cst {dimension_numbers = #tpu.dot_dimension_numbers<[1], [1], [0], [0], [0, 0, 1, 0], [], []>} : vector<128x128xbf16>, vector<128x128xbf16>, vector<128x128xf32> -> vector<128x128xf32>
    %3 = arith.negf %2 : vector<128x128xf32>
    %4 = math.exp %3 : vector<128x128xf32>
    %cst_3 = arith.constant 1.000000e+00 : f32
    %5 = vector.broadcast %cst_3 : f32 to vector<128x128xf32>
    %6 = arith.addf %5, %4 : vector<128x128xf32>
    %7 = arith.divf %5, %6 : vector<128x128xf32>
    %c0_4 = arith.constant 0 : index
    %c0_5 = arith.constant 0 : index
    %8 = vector.load %arg4[%c0_4, %c0_5] : memref<128x128xf32, #tpu.memory_space<vmem>>, vector<128x128xf32>
    tpu.vector_store %arg4[%c0_4, %c0_5], %7 {strides = array<i32>} : memref<128x128xf32, #tpu.memory_space<vmem>>, vector<128x128xf32>,
    return
  }
  func.func @transform_0(%arg0: i32, %arg1: i32) -> (i32, i32) {
    %c0_i32 = arith.constant 0 : i32
    %c0_i32_0 = arith.constant 0 : i32
    return %arg0, %c0_i32 : i32, i32
  }
  func.func @transform_1(%arg0: i32, %arg1: i32) -> (i32, i32) {
    %c0_i32 = arith.constant 0 : i32
    %c0_i32_0 = arith.constant 0 : i32
    return %arg1, %c0_i32 : i32, i32
  }
  func.func @transform_2(%arg0: i32, %arg1: i32) -> (i32, i32) {
    %c0_i32 = arith.constant 0 : i32
    return %arg0, %arg1 : i32, i32
  }
}

</mosaic_0001>

<bundles_post_ra>
// kernel: gae_forward.3
= control target key start
LH: loop header
LB: loop body
LE: loop exit
PB: predicated region body
PF: predicated region fallthrough
CT: control target
= control target key end

     0   :  { %7 = vsyncpa [#allocation3], 0  ;;  %s1188_s0 = inlined_call_operand.vmem [shape: bf16[256,128], index: 0, kind: input, shape index: {}, may-alias: {0,1}]   ;;  %s1189_s1 = inlined_call_operand.vmem [shape: bf16[256,128], index: 1, kind: input, shape index: {}, may-alias: {0,1}]   ;;  %s1190_s2 = inlined_call_operand.hbm [shape: f32[256,256], index: 2, kind: output, shape index: {}]  }
   0x1   :  { %9 = vsyncpa [#allocation3 + $0x1], 0  ;;  %s1004_s9 = smov 0   ;;  %s1006_s10 = smov 0  }
   0x2   :  { %s1008_s11 = smov 0   ;;  %s1010_s12 = smov 0  }
   0x3   :  { %s1012_s13 = smov 0   ;;  %s1014_s14 = smov 0  }
   0x4   :  { %s1016_s15 = smov 0   ;;  %s1018_s16 = smov 0  }
   0x5 LB: > { %s622_s17 = sadd.s32 4294967295, %s983_s16   ;;  %s623_s18 = sadd.s32 4294967294, %s983_s16   ;;  %s983_s16 = sphi %s1018_s16, %s15_s16   ;;  %s979_s15 = sphi %s1016_s15, %s1199_s15   ;;  %s975_s14 = sphi %s1014_s14, %s1198_s14   ;;  %s971_s13 = sphi %s1012_s13, %s1197_s13   ;;  %s967_s12 = sphi %s1010_s12, %s1196_s12   ;;  %s963_s11 = sphi %s1008_s11, %s1195_s11   ;;  %s959_s10 = sphi %s1006_s10, %s1194_s10   ;;  %s955_s9 = sphi %s1004_s9, %s1193_s9  }
   0x6   : > { %s24_s19 = sadd.s32 1, %s975_s14  ;;  %s27_s20 = sadd.s32 1, %s979_s15 }
   0x7   : > { %p25_p0 = scmp.ge.s32.totalorder %s24_s19, 2  ;;  %p98_p1 = scmp.ne.s32.totalorder %s963_s11, %s959_s10 }
   0x8   : > { %p99_p2 = scmp.eq.s32.totalorder %s622_s17, 3  ;;  %p104_p5 = scmp.ne.s32.totalorder %s959_s10, %s955_s9 }
   0x9   : > { %s1201_s19 = smov (%p25_p0, %s24_s19), 0  ;;  %s1203_s20 = smov (!%p25_p0, %s27_s20), %s979_s15 }
   0xa   : > { %s84_s21 = ssub.s32 %s975_s14, %s1201_s19  ;;  %p1055_p3 = por %p99_p2, %p98_p1 }
   0xb   : > { %p29_p4 = scmp.ge.s32.totalorder %s1203_s20, 2  ;;  %p105_p6 = scmp.eq.s32.totalorder %s623_s18, 3 }
   0xc   : > { %p626_p7 = scmp.ge.s32.totalorder %s983_s16, 1  ;;  %p141_p9 = scmp.lt.s32.totalorder %s983_s16, 5 }
   0xd   : > { %s1205_s20 = smov (%p29_p4, %s1203_s20), 0  ;;  %p1064_p8 = por %p105_p6, %p104_p5 }
   0xe   : > { %s83_s24 = ssub.s32 %s979_s15, %s1205_s20  ;;  %s88_s25 = sadd.s32 1, %s963_s11 }
   0xf   : > { %s85_s26 = sor.u32 %s84_s21, %s83_s24  ;;  %p142_p10 = pnand %p626_p7, %p141_p9 }
  0x10   : > { %p86_p11 = scmp.eq.s32.totalorder %s85_s26, 0  ;;  %s630_s28 = sshll.u32 (!%p142_p10), %s967_s12, 4 }
  0x11   : > { %145 = sbr.rel (%p142_p10) target bundleno = 374 (0x176), region = 28  ;;  %s628_s29 = sshll.u32 (!%p142_p10), %s971_s13, 4 }
  0x12   : > { %s1073_s27 = scalar_select %p86_p11, %s963_s11, %s88_s25  }
  0x13   : > { %p175_p12 = scmp.lt.s32.totalorder (!%p142_p10), %s630_s28, 31  ;;  %p169_p13 = scmp.lt.s32.totalorder (!%p142_p10), %s628_s29, 31 }
  0x14   : > { %s165_s18 = sand.u32 (!%p142_p10), 1, %s959_s10   ;;  %s670_s25 = sshll.u32 (!%p142_p10), %s971_s13, 5 }
  0x15   : > { %s627_s21 = sshll.u32 (!%p142_p10), %s165_s18, 7  ;;  %s532_s26 = sadd.s32 (!%p142_p10), %s967_s12, %s670_s25 }
  0x16   : > { %s1106_s24 = scalar_lea.vmem (!%p142_p10), [#allocation2], %s627_s21  ;;  %s1136_s12 = scalar_lea.sflag (!%p142_p10), [#allocation3], %s165_s18 }
  0x18   : > { %s1207_s28 = smov (!%p175_p12, %s630_s28), 31  ;;  %s1209_s29 = smov (!%p169_p13, %s628_s29), 31 }
  0x19   : > { %s631_s30 = sshll.u32 %s1207_s28, 2  ;;  %s629_s6 = sshll.u32 %s1209_s29, 2 }
  0x1a   : > { %s1080_s5 = scalar_lea.vmem %s1189_s1, %s631_s30  ;;  %s1087_s17 = scalar_lea.vmem %s1188_s0, %s629_s6 }
  0x1b   : > { %v809_v0 = vld [vmem:[%s1080_s5] sm:$0xff]   ;;  %v810_v1 = vld [vmem:[%s1080_s5 + $0x8] sm:$0xff]   ;;  %v811_v2 = vld [vmem:[%s1080_s5 + $0x10] sm:$0xff]   ;;  %s667_s28 = sshll.u32 %s532_s26, 7  ;;  %s535_s29 = sshll.u32 %s1106_s24, 4  ;;  %s1129_s29 = int_to_ptr.vmem [resolvable:$true] %s535_s29 }
  0x1c   : > { %687 = vmatprep.subr.bf16.mxu0 %v809_v0  ;;  %719 = vmatprep.subr.bf16.mxu1 %v809_v0  ;;  %v817_v3 = vld [vmem:[%s1087_s17] sm:$0xff]   ;;  %v812_v5 = vld [vmem:[%s1080_s5 + $0x18] sm:$0xff]   ;;  %v814_v7 = vld [vmem:[%s1080_s5 + $0x28] sm:$0xff]   ;;  %s1127_s4 = scalar_lea.hbm %s1190_s2, %s667_s28  ;;  %s889_s13 = scalar_lea.vmem %s1129_s29, 2048 }
  0x1d   : > { %688 = vmatpush3.bf16.xpose.msra.mxu0 %v809_v0  ;;  %727 = vmatpush3.bf16.xpose.msra.mxu1 %v809_v0  ;;  %v818_v4 = vld [vmem:[%s1087_s17 + $0x20] sm:$0xff]   ;;  %v815_v8 = vld [vmem:[%s1080_s5 + $0x30] sm:$0xff]   ;;  %v816_v9 = vld [vmem:[%s1080_s5 + $0x38] sm:$0xff]   ;;  %p890_p0 = scmp.ne.s32.totalorder %s1129_s29, %s889_s13 }
  0x1e   : > { %689 = vmatprep.subr.bf16.mxu0 %v810_v1  ;;  %720 = vmatprep.subr.bf16.mxu1 %v810_v1  ;;  %v813_v6 = vld [vmem:[%s1080_s5 + $0x20] sm:$0xff]   ;;  %v819_v10 = vld [vmem:[%s1087_s17 + $0x8] sm:$0xff]   ;;  %v821_v12 = vld [vmem:[%s1087_s17 + $0x10] sm:$0xff]   ;;  %s985_s5 = smov [#allocation2]  }
  0x1f   : > { %703 = vmatprep.mubr.bf16.mxu0 %v817_v3  ;;  %711 = vmatprep.mubr.bf16.mxu1 %v818_v4  ;;  %v820_v11 = vld [vmem:[%s1087_s17 + $0x28] sm:$0xff]   ;;  %v822_v13 = vld [vmem:[%s1087_s17 + $0x30] sm:$0xff]   ;;  %v823_v14 = vld [vmem:[%s1087_s17 + $0x18] sm:$0xff]   ;;  %p891_p1 = pnand %p890_p0, %p1055_p3  ;;  %s893_s6 = sshll.u32 %s985_s5, 4  ;;  %s894_s6 = int_to_ptr.vmem [resolvable:$false] %s893_s6 }
  0x20   : > { %v824_v15 = vld [vmem:[%s1087_s17 + $0x38] sm:$0xff]   ;;  %s895_s7 = scalar_lea.vmem %s894_s6, 4096  ;;  %p896_p4 = scmp.lt.s32.totalorder %s1129_s29, %s894_s6 }
  0x21   : > { %p892_p2 = pneg %p891_p1  ;;  %p897_p5 = scmp.lt.s32.totalorder %s895_s7, %s889_s13 }
  0x23   : > { %p898_p6 = por %p897_p5, %p896_p4 }
  0x25   : > { %690 = vmatpush3.bf16.xpose.msra.mxu0 %v810_v1  ;;  %728 = vmatpush3.bf16.xpose.msra.mxu1 %v810_v1  ;;  %p899_p7 = pnand %p898_p6, %p892_p2 }
  0x26   : > { %691 = vmatprep.subr.bf16.mxu0 %v811_v2  ;;  %721 = vmatprep.subr.bf16.mxu1 %v811_v2 }
  0x2d   : > { %692 = vmatpush3.bf16.xpose.msra.mxu0 %v811_v2  ;;  %729 = vmatpush3.bf16.xpose.msra.mxu1 %v811_v2 }
  0x2e   : > { %693 = vmatprep.subr.bf16.mxu0 %v812_v5  ;;  %722 = vmatprep.subr.bf16.mxu1 %v812_v5 }
  0x35   : > { %694 = vmatpush3.bf16.xpose.msra.mxu0 %v812_v5  ;;  %730 = vmatpush3.bf16.xpose.msra.mxu1 %v812_v5 }
  0x36   : > { %695 = vmatprep.subr.bf16.mxu0 %v813_v6  ;;  %723 = vmatprep.subr.bf16.mxu1 %v813_v6 }
  0x3d   : > { %696 = vmatpush3.bf16.xpose.msra.mxu0 %v813_v6  ;;  %731 = vmatpush3.bf16.xpose.msra.mxu1 %v813_v6 }
  0x3e   : > { %697 = vmatprep.subr.bf16.mxu0 %v814_v7  ;;  %724 = vmatprep.subr.bf16.mxu1 %v814_v7 }
  0x45   : > { %698 = vmatpush3.bf16.xpose.msra.mxu0 %v814_v7  ;;  %732 = vmatpush3.bf16.xpose.msra.mxu1 %v814_v7 }
  0x46   : > { %699 = vmatprep.subr.bf16.mxu0 %v815_v8  ;;  %725 = vmatprep.subr.bf16.mxu1 %v815_v8 }
  0x4d   : > { %700 = vmatpush3.bf16.xpose.msra.mxu0 %v815_v8  ;;  %733 = vmatpush3.bf16.xpose.msra.mxu1 %v815_v8 }
  0x4e   : > { %701 = vmatprep.subr.bf16.mxu0 %v816_v9  ;;  %726 = vmatprep.subr.bf16.mxu1 %v816_v9 }
  0x55   : > { %702 = vmatpush3.bf16.xpose.msra.mxu0 %v816_v9  ;;  %734 = vmatpush3.bf16.xpose.msra.mxu1 %v816_v9 }
  0x5c   : > { %704 = vmatmul.mubr.bf16.vlgmr.msra.gmra.mrb[0].mxu0 %v819_v10  ;;  %712 = vmatmul.mubr.bf16.vlgmr.msra.gmra.mrb[0].mxu1 %v820_v11 }
  0x5d   : > { %707 = vmatprep.mubr.bf16.mxu0 %v821_v12  ;;  %715 = vmatprep.mubr.bf16.mxu1 %v822_v13 }
  0x64   : > { %708 = vmatmul.mubr.bf16.gmra.mrb[4].mxu0 %v823_v14  ;;  %716 = vmatmul.mubr.bf16.gmra.mrb[4].mxu1 %v824_v15 }
 0x12f   : > { %v705_v16 = vpop.f32.mrb[0].mxu0  ;;  %v713_v17 = vpop.f32.mrb[0].mxu1 }
 0x130   : > { %v650_v18 = vmul.f32 -1.442695, %v705_v16  ;;  %v658_v19 = vmul.f32 -1.442695, %v713_v17  ;;  %v344_v20 = vpop.f32.mrb[1].mxu0  ;;  %v376_v21 = vpop.f32.mrb[1].mxu1 }
 0x131   : > { %v648_v22 = vmul.f32 -1.442695, %v344_v20  ;;  %v656_v23 = vmul.f32 -1.442695, %v376_v21  ;;  %v706_v24 = vpop.f32.mrb[2].mxu0  ;;  %v714_v25 = vpop.f32.mrb[2].mxu1 }
 0x132   : > { %825 = vpow2.f32 %v650_v18  ;;  %v651_v26 = vmul.f32 -1.442695, %v706_v24  ;;  %v347_v27 = vpop.f32.mrb[3].mxu0  ;;  %v379_v28 = vpop.f32.mrb[3].mxu1  ;;  %v659_v29 = vmul.f32 -1.442695, %v714_v25 }
 0x133   : > { %827 = vpow2.f32 %v658_v19  ;;  %v649_v30 = vmul.f32 -1.442695, %v347_v27  ;;  %v657_v31 = vmul.f32 -1.442695, %v379_v28 }
 0x134   : > { %829 = vpow2.f32 %v648_v22 }
 0x135   : > { %831 = vpow2.f32 %v656_v23 }
 0x136   : > { %833 = vpow2.f32 %v651_v26 }
 0x137   : > { %835 = vpow2.f32 %v659_v29  ;;  %v709_v32 = vpop.f32.mrb[4].mxu0  ;;  %v717_v33 = vpop.f32.mrb[4].mxu1 }
 0x138   : > { %837 = vpow2.f32 %v649_v30  ;;  %v654_v34 = vmul.f32 -1.442695, %v709_v32  ;;  %v662_v35 = vmul.f32 -1.442695, %v717_v33  ;;  %v360_v36 = vpop.f32.mrb[5].mxu0  ;;  %v392_v37 = vpop.f32.mrb[5].mxu1 }
 0x139   : > { %839 = vpow2.f32 %v657_v31  ;;  %v652_v38 = vmul.f32 -1.442695, %v360_v36  ;;  %v660_v39 = vmul.f32 -1.442695, %v392_v37  ;;  %v710_v40 = vpop.f32.mrb[6].mxu0  ;;  %v718_v41 = vpop.f32.mrb[6].mxu1 }
 0x13a   : > { %841 = vpow2.f32 %v654_v34  ;;  %v655_v42 = vmul.f32 -1.442695, %v710_v40  ;;  %v363_v43 = vpop.f32.mrb[7].mxu0  ;;  %v395_v44 = vpop.f32.mrb[7].mxu1  ;;  %v663_v6 = vmul.f32 -1.442695, %v718_v41 }
 0x13b   : > { %843 = vpow2.f32 %v662_v35  ;;  %v653_v9 = vmul.f32 -1.442695, %v363_v43  ;;  %v661_v11 = vmul.f32 -1.442695, %v395_v44 }
 0x13c   : > { %v826_v45 = vpop.eup %825  ;;  %845 = vpow2.f32 %v652_v38 }
 0x13d   : > { %v828_v46 = vpop.eup %827  ;;  %v457_v47 = vadd.f32 1.0, %v826_v45  ;;  %847 = vpow2.f32 %v660_v39 }
 0x13e   : > { %v830_v48 = vpop.eup %829  ;;  %v465_v49 = vadd.f32 1.0, %v828_v46  ;;  %849 = vpow2.f32 %v655_v42 }
 0x13f   : > { %v832_v50 = vpop.eup %831  ;;  %851 = vrcp.f32 %v457_v47  ;;  %v455_v51 = vadd.f32 1.0, %v830_v48 }
 0x140   : > { %v834_v52 = vpop.eup %833  ;;  %853 = vrcp.f32 %v465_v49  ;;  %v463_v53 = vadd.f32 1.0, %v832_v50 }
 0x141   : > { %v836_v54 = vpop.eup %835  ;;  %855 = vrcp.f32 %v455_v51  ;;  %v458_v55 = vadd.f32 1.0, %v834_v52 }
 0x142   : > { %v838_v56 = vpop.eup %837  ;;  %857 = vrcp.f32 %v463_v53  ;;  %v466_v57 = vadd.f32 1.0, %v836_v54 }
 0x143   : > { %v840_v58 = vpop.eup %839  ;;  %859 = vrcp.f32 %v458_v55  ;;  %v456_v59 = vadd.f32 1.0, %v838_v56 }
 0x144   : > { %v842_v60 = vpop.eup %841  ;;  %861 = vrcp.f32 %v466_v57  ;;  %v464_v61 = vadd.f32 1.0, %v840_v58 }
 0x145   : > { %v844_v62 = vpop.eup %843  ;;  %863 = vrcp.f32 %v456_v59  ;;  %v461_v63 = vadd.f32 1.0, %v842_v60 }
 0x146   : > { %v846_v0 = vpop.eup %845  ;;  %865 = vrcp.f32 %v464_v61  ;;  %v469_v1 = vadd.f32 1.0, %v844_v62 }
 0x147   : > { %v848_v2 = vpop.eup %847  ;;  %867 = vrcp.f32 %v461_v63  ;;  %v459_v3 = vadd.f32 1.0, %v846_v0 }
 0x148   : > { %v850_v4 = vpop.eup %849  ;;  %869 = vrcp.f32 %v469_v1  ;;  %v467_v5 = vadd.f32 1.0, %v848_v2 }
 0x149   : > { %v852_v7 = vpop.eup %851  ;;  %871 = vrcp.f32 %v459_v3  ;;  %v462_v8 = vadd.f32 1.0, %v850_v4 }
 0x14a   : > { %v854_v10 = vpop.eup %853  ;;  %505 = vst [vmem:[%s1106_s24 + $0x10] sm:$0xff] %v852_v7  ;;  %873 = vrcp.f32 %v467_v5 }
 0x14b   : > { %v856_v12 = vpop.eup %855  ;;  %513 = vst [vmem:[%s1106_s24 + $0x50] sm:$0xff] %v854_v10  ;;  %875 = vrcp.f32 %v462_v8 }
 0x14c   : > { %v858_v13 = vpop.eup %857  ;;  %503 = vst [vmem:[%s1106_s24] sm:$0xff] %v856_v12  ;;  %877 = vpow2.f32 %v663_v6 }
 0x14d   : > { %v860_v14 = vpop.eup %859  ;;  %511 = vst [vmem:[%s1106_s24 + $0x40] sm:$0xff] %v858_v13  ;;  %879 = vpow2.f32 %v653_v9 }
 0x14e   : > { %v862_v15 = vpop.eup %861  ;;  %506 = vst [vmem:[%s1106_s24 + $0x18] sm:$0xff] %v860_v14  ;;  %881 = vpow2.f32 %v661_v11 }
 0x14f   : > { %v864_v16 = vpop.eup %863  ;;  %514 = vst [vmem:[%s1106_s24 + $0x58] sm:$0xff] %v862_v15 }
 0x150   : > { %v866_v17 = vpop.eup %865  ;;  %504 = vst [vmem:[%s1106_s24 + $0x8] sm:$0xff] %v864_v16 }
 0x151   : > { %v868_v18 = vpop.eup %867  ;;  %512 = vst [vmem:[%s1106_s24 + $0x48] sm:$0xff] %v866_v17 }
 0x152   : > { %v870_v19 = vpop.eup %869  ;;  %509 = vst [vmem:[%s1106_s24 + $0x30] sm:$0xff] %v868_v18 }
 0x153   : > { %v872_v20 = vpop.eup %871  ;;  %517 = vst [vmem:[%s1106_s24 + $0x70] sm:$0xff] %v870_v19 }
 0x154   : > { %v874_v21 = vpop.eup %873  ;;  %507 = vst [vmem:[%s1106_s24 + $0x20] sm:$0xff] %v872_v20 }
 0x155   : > { %v876_v22 = vpop.eup %875  ;;  %515 = vst [vmem:[%s1106_s24 + $0x60] sm:$0xff] %v874_v21 }
 0x156   : > { %v878_v23 = vpop.eup %877  ;;  %510 = vst [vmem:[%s1106_s24 + $0x38] sm:$0xff] %v876_v22 }
 0x157   : > { %v880_v24 = vpop.eup %879  ;;  %v470_v25 = vadd.f32 1.0, %v878_v23 }
 0x158   : > { %v882_v26 = vpop.eup %881  ;;  %v460_v27 = vadd.f32 1.0, %v880_v24 }
 0x159   : > { %883 = vrcp.f32 %v470_v25  ;;  %v468_v28 = vadd.f32 1.0, %v882_v26 }
 0x15a   : > { %885 = vrcp.f32 %v460_v27 }
 0x15b   : > { %887 = vrcp.f32 %v468_v28 }
 0x163   : > { %v884_v29 = vpop.eup %883 }
 0x164   : > { %v886_v30 = vpop.eup %885  ;;  %518 = vst [vmem:[%s1106_s24 + $0x78] sm:$0xff] %v884_v29 }
 0x165   : > { %v888_v31 = vpop.eup %887  ;;  %508 = vst [vmem:[%s1106_s24 + $0x28] sm:$0xff] %v886_v30 }
 0x166   : > { %516 = vst [vmem:[%s1106_s24 + $0x68] sm:$0xff] %v888_v31 }
 0x167   : > { %902 = shalt.err (!%p899_p7)
}
 0x168   : > { %s903_s8 = scalar_lea.hbm %s1127_s4, 2048  ;;  %s907_s21 = scalar_lea.hbm %s1190_s2, 8192 }
 0x169   : > { %p904_p9 = scmp.ne.s32.totalorder %s1127_s4, %s903_s8  ;;  %p908_p12 = scmp.lt.u32.totalorder %s1127_s4, %s1190_s2 }
 0x16a   : > { %p909_p13 = scmp.lt.u32.totalorder %s907_s21, %s903_s8  ;;  %p911_p1 = scmp.lt.u32.totalorder %s903_s8, %s1127_s4 }
 0x16b   : > { %p905_p10 = pnand %p904_p9, %p1055_p3 }
 0x16c   : > { %p910_p0 = por %p909_p13, %p908_p12 }
 0x16d   : > { %p906_p11 = pneg %p905_p10 }
 0x16e   : > { %p912_p2 = por %p911_p1, %p910_p0 }
 0x170   : > { %p913_p4 = pnand %p912_p2, %p906_p11 }
 0x172   : > { %916 = shalt.err (!%p913_p4)
}
 0x173   : > { %s986_s26 = smov 128   ;;  %s987_s28 = smov 256  }
 0x174   : > { %s988_s30 = smov 8  }
 0x175   : > { %735 = dma.vmem_to_hbm [thread:$0]  (%p1055_p3), %s1129_s29, 2048, %s1127_s4, %s1136_s12, %s986_s26, %s987_s28, %s988_s30  }
 0x176 PF: > { %p741_p5 = scmp.ge.s32.totalorder %s983_s16, 2  ;;  %s550_s3 = sand.u32 1, %s955_s9  }
 0x177   : > { %s551_s13 = scalar_lea.sflag [#allocation3], %s550_s3 }
 0x178   : > { %p738_p6 = pnand %p741_p5, %p1064_p8 }
 0x17a   : > { %950 = dma.done.wait (!%p738_p6), %s551_s13, 2048  }
 0x17b   : > { %952 = vsyncadd (!%p738_p6), %s551_s13, 4294965248  ;;  %s15_s16 = sadd.s32 1, %s983_s16   ;;  %s1193_s9 = smov %s959_s10 }
 0x17c   : > { %p12_p7 = scmp.ge.s32.totalorder %s15_s16, 6   ;;  %s1194_s10 = smov %s963_s11 }
 0x17d   : > { %s1195_s11 = smov %s1073_s27  ;;  %s1196_s12 = smov %s975_s14 }
 0x17e   : > { %s1197_s13 = smov %s979_s15  ;;  %s1198_s14 = smov %s1201_s19 }
 0x17f   : > { %s1199_s15 = smov %s1205_s20  ;;  %14 = sbr.rel (!%p12_p7) target bundleno = 5 (0x5), region = 66 }
 0x186   :  { %556 = vsyncpa [#allocation3], 1 }
 0x187   :  { %558 = vsyncpa [#allocation3 + $0x1], 1 }

// kernel: gae_forward.2
= control target key start
LH: loop header
LB: loop body
LE: loop exit
PB: predicated region body
PF: predicated region fallthrough
CT: control target
= control target key end

     0   :  { %s1792_s18 = smov 0   ;;  %s1794_s19 = smov 0   ;;  %s2084_s0 = inlined_call_operand.vmem [shape: bf16[256,256], index: 0, kind: input, shape index: {}]   ;;  %s2085_s1 = inlined_call_operand.vmem [shape: f32[256,128], index: 1, kind: input, shape index: {}]   ;;  %s2086_s2 = inlined_call_operand.vmem [shape: f32[128,128], index: 2, kind: input, shape index: {}]   ;;  %s2087_s3 = inlined_call_operand.vmem [shape: f32[1,128], index: 3, kind: input, shape index: {}]   ;;  %s2088_s4 = inlined_call_operand.vmem [shape: f32[1,128], index: 4, kind: input, shape index: {}]   ;;  %s2089_s5 = inlined_call_operand.vmem [shape: bf16[256,128], index: 5, kind: output, shape index: {}]  }
   0x1   :  { %s1796_s20 = smov 0   ;;  %s1798_s21 = smov 0  }
   0x2   :  { %s1800_s22 = smov 0   ;;  %s1802_s23 = smov 0  }
   0x3   :  { %s1804_s24 = smov 0  }
   0x4 LB: > { %s24_s25 = sadd.s32 1, %s1750_s22  ;;  %s27_s26 = sadd.s32 1, %s1754_s23  ;;  %s1758_s24 = sphi %s1804_s24, %s15_s24   ;;  %s1754_s23 = sphi %s1802_s23, %s2095_s23   ;;  %s1750_s22 = sphi %s1800_s22, %s2094_s22   ;;  %s1746_s21 = sphi %s1798_s21, %s2093_s21   ;;  %s1742_s20 = sphi %s1796_s20, %s2092_s20   ;;  %s1738_s19 = sphi %s1794_s19, %s2091_s19   ;;  %s1734_s18 = sphi %s1792_s18, %s2090_s18  }
   0x5   : > { %p25_p0 = scmp.ge.s32.totalorder %s24_s25, 2  ;;  %p43_p1 = scmp.ne.s32.totalorder %s1738_s19, %s1734_s18 }
   0x6   : > { %p44_p2 = scmp.eq.s32.totalorder %s1758_s24, 0  ;;  %s36_s30 = sadd.s32 1, %s1738_s19 }
   0x7   : > { %s2097_s25 = smov (%p25_p0, %s24_s25), 0  ;;  %s2099_s26 = smov (!%p25_p0, %s27_s26), %s1754_s23 }
   0x8   : > { %p45_p3 = por %p44_p2, %p43_p1  ;;  %p29_p4 = scmp.ge.s32.totalorder %s2099_s26, 2 }
   0x9   : > { %s32_s27 = ssub.s32 %s1750_s22, %s2097_s25  ;;  %p1236_p6 = scmp.ge.s32.totalorder %s1758_s24, 4 }
   0xa   : > { %s2101_s26 = smov (%p29_p4, %s2099_s26), 0 }
   0xb   : > { %s31_s28 = ssub.s32 %s1754_s23, %s2101_s26  ;;  %193 = sbr.rel (%p1236_p6) target bundleno = 34 (0x22), region = 28 }
   0xc   : > { %s33_s29 = sor.u32 %s32_s27, %s31_s28 }
   0xd   : > { %p34_p5 = scmp.eq.s32.totalorder %s33_s29, 0 }
   0xf   : > { %s1843_s6 = scalar_select %p34_p5, %s1738_s19, %s36_s30  }
  0x12   : > { %196 = sbr.rel (!%p45_p3) target bundleno = 34 (0x22), region = 32  ;;  %s198_s7 = sand.u32 (%p45_p3), 1, %s1738_s19  }
  0x13   : > { %s1269_s8 = sshll.u32 (%p45_p3), %s1754_s23, 5  ;;  %s1237_s9 = sshll.u32 (%p45_p3), %s198_s7, 6 }
  0x14   : > { %s203_s10 = sadd.s32 (%p45_p3), %s1750_s22, %s1269_s8  ;;  %s200_s15 = scalar_lea.vmem (%p45_p3), [#allocation4], %s1237_s9 }
  0x15   : > { %s1240_s11 = sshll.u32 (%p45_p3), %s203_s10, 2 }
  0x16   : > { %s1852_s14 = scalar_lea.vmem (%p45_p3), %s2084_s0, %s1240_s11 }
  0x17   : > { %v221_v0 = vld [vmem:[%s1852_s14] sm:$0xf] (%p45_p3)  ;;  %v223_v1 = vld [vmem:[%s1852_s14 + $0x8] sm:$0xf] (%p45_p3)  ;;  %v225_v2 = vld [vmem:[%s1852_s14 + $0x10] sm:$0xf] (%p45_p3) }
  0x18   : > { %222 = vst [vmem:[%s200_s15] sm:$0xf] (%p45_p3), %v221_v0  ;;  %224 = vst [vmem:[%s200_s15 + $0x4] sm:$0xf] (%p45_p3), %v223_v1  ;;  %v227_v3 = vld [vmem:[%s1852_s14 + $0x18] sm:$0xf] (%p45_p3) }
  0x19   : > { %226 = vst [vmem:[%s200_s15 + $0x8] sm:$0xf] %v225_v2  ;;  %v229_v4 = vld [vmem:[%s1852_s14 + $0x20] sm:$0xf]  ;;  %v231_v5 = vld [vmem:[%s1852_s14 + $0x28] sm:$0xf] }
  0x1a   : > { %228 = vst [vmem:[%s200_s15 + $0xc] sm:$0xf] %v227_v3  ;;  %230 = vst [vmem:[%s200_s15 + $0x10] sm:$0xf] %v229_v4  ;;  %v233_v6 = vld [vmem:[%s1852_s14 + $0x30] sm:$0xf] }
  0x1b   : > { %232 = vst [vmem:[%s200_s15 + $0x14] sm:$0xf] %v231_v5  ;;  %v235_v7 = vld [vmem:[%s1852_s14 + $0x38] sm:$0xf]  ;;  %v237_v8 = vld [vmem:[%s1852_s14 + $0x40] sm:$0xf] }
  0x1c   : > { %234 = vst [vmem:[%s200_s15 + $0x18] sm:$0xf] %v233_v6  ;;  %236 = vst [vmem:[%s200_s15 + $0x1c] sm:$0xf] %v235_v7  ;;  %v239_v9 = vld [vmem:[%s1852_s14 + $0x48] sm:$0xf] }
  0x1d   : > { %238 = vst [vmem:[%s200_s15 + $0x20] sm:$0xf] %v237_v8  ;;  %v241_v10 = vld [vmem:[%s1852_s14 + $0x50] sm:$0xf]  ;;  %v243_v11 = vld [vmem:[%s1852_s14 + $0x58] sm:$0xf] }
  0x1e   : > { %240 = vst [vmem:[%s200_s15 + $0x24] sm:$0xf] %v239_v9  ;;  %242 = vst [vmem:[%s200_s15 + $0x28] sm:$0xf] %v241_v10  ;;  %v245_v12 = vld [vmem:[%s1852_s14 + $0x60] sm:$0xf] }
  0x1f   : > { %244 = vst [vmem:[%s200_s15 + $0x2c] sm:$0xf] %v243_v11  ;;  %v247_v13 = vld [vmem:[%s1852_s14 + $0x68] sm:$0xf]  ;;  %v249_v14 = vld [vmem:[%s1852_s14 + $0x70] sm:$0xf] }
  0x20   : > { %246 = vst [vmem:[%s200_s15 + $0x30] sm:$0xf] %v245_v12  ;;  %248 = vst [vmem:[%s200_s15 + $0x34] sm:$0xf] %v247_v13  ;;  %v251_v15 = vld [vmem:[%s1852_s14 + $0x78] sm:$0xf] }
  0x21   : > { %250 = vst [vmem:[%s200_s15 + $0x38] sm:$0xf] %v249_v14  ;;  %252 = vst [vmem:[%s200_s15 + $0x3c] sm:$0xf] %v251_v15 }
  0x22 PF: > { %p1241_p7 = scmp.ge.s32.totalorder %s1758_s24, 1  ;;  %p315_p8 = scmp.lt.s32.totalorder %s1758_s24, 5 }
  0x24   : > { %p316_p9 = pnand %p1241_p7, %p315_p8 }
  0x25   : > { %s322_s16 = sand.u32 (!%p316_p9), 1, %s1734_s18   ;;  %s1243_s17 = sshll.u32 (!%p316_p9), %s1742_s20, 4 }
  0x26   : > { %319 = sbr.rel (%p316_p9) target bundleno = 564 (0x234), region = 77  ;;  %s1242_s27 = sshll.u32 (!%p316_p9), %s322_s16, 6 }
  0x27   : > { %p356_p10 = scmp.lt.s32.totalorder (!%p316_p9), %s1243_s17, 31  ;;  %s1245_s28 = sshll.u32 (!%p316_p9), %s1746_s21, 4 }
  0x28   : > { %p362_p11 = scmp.lt.s32.totalorder (!%p316_p9), %s1245_s28, 31  ;;  %s1885_s18 = scalar_lea.vmem (!%p316_p9), [#allocation4], %s1242_s27 }
  0x29   : > { %p1247_p12 = scmp.ne.s32.totalorder (!%p316_p9), %s1742_s20, 0 }
  0x2d   : > { %s2103_s17 = smov (!%p356_p10, %s1243_s17), 31  ;;  %s2105_s28 = smov (!%p362_p11, %s1245_s28), 31 }
  0x2e   : > { %s1244_s29 = sshll.u32 %s2103_s17, 3  ;;  %s1246_s9 = sshll.u32 %s2105_s28, 2  ;;  %vm387_vm0 = vcmask (!%p1247_p12), 7168   ;;  %v1760_v16 = vmov (!%p1247_p12), 0.0  }
  0x2f   : > { %s1878_s8 = scalar_lea.vmem %s2085_s1, %s1244_s29  ;;  %s1883_s12 = scalar_lea.vmem %s2089_s5, %s1246_s9  ;;  %371 = vst [vmem:[#allocation2] sm:$0xff] (!%p1247_p12), %v1760_v16  ;;  %372 = vst [vmem:[#allocation2 + $0x8] sm:$0xff] (!%p1247_p12), %v1760_v16 }
  0x30   : > { %370 = sbr.rel (%p1247_p12) target bundleno = 63 (0x3f), region = 85  ;;  %373 = vst [vmem:[#allocation2 + $0x10] sm:$0xff] (!%p1247_p12), %v1760_v16  ;;  %374 = vst [vmem:[#allocation2 + $0x18] sm:$0xff] (!%p1247_p12), %v1760_v16 }
  0x31   : > { %375 = vst [vmem:[#allocation2 + $0x20] sm:$0xff] (!%p1247_p12), %v1760_v16  ;;  %376 = vst [vmem:[#allocation2 + $0x28] sm:$0xff] (!%p1247_p12), %v1760_v16 }
  0x32   : > { %377 = vst [vmem:[#allocation2 + $0x30] sm:$0xff] (!%p1247_p12), %v1760_v16  ;;  %378 = vst [vmem:[#allocation2 + $0x38] sm:$0xff] (!%p1247_p12), %v1760_v16 }
  0x33   : > { %379 = vst [vmem:[#allocation2 + $0x40] sm:$0xff] (!%p1247_p12), %v1760_v16  ;;  %380 = vst [vmem:[#allocation2 + $0x48] sm:$0xff] (!%p1247_p12), %v1760_v16 }
  0x34   : > { %381 = vst [vmem:[#allocation2 + $0x50] sm:$0xff] (!%p1247_p12), %v1760_v16  ;;  %382 = vst [vmem:[#allocation2 + $0x58] sm:$0xff] (!%p1247_p12), %v1760_v16 }
  0x35   : > { %383 = vst [vmem:[#allocation2 + $0x60] sm:$0xff] (!%p1247_p12), %v1760_v16  ;;  %384 = vst [vmem:[#allocation2 + $0x68] sm:$0xff] (!%p1247_p12), %v1760_v16 }
  0x36   : > { %385 = vst [vmem:[#allocation2 + $0x70] sm:$0xff] (!%p1247_p12), %v1760_v16  ;;  %386 = vst [vmem:[#allocation2 + $0x78] sm:$0xff] (!%p1247_p12), %v1760_v16 }
  0x37   : > { %388 = vst.msk [vmem:[#allocation3] sm:$0xff] %vm387_vm0, %v1760_v16  ;;  %389 = vst.msk [vmem:[#allocation3 + $0x8] sm:$0xff] %vm387_vm0, %v1760_v16 }
  0x38   : > { %390 = vst.msk [vmem:[#allocation3 + $0x10] sm:$0xff] %vm387_vm0, %v1760_v16  ;;  %391 = vst.msk [vmem:[#allocation3 + $0x18] sm:$0xff] %vm387_vm0, %v1760_v16 }
  0x39   : > { %392 = vst.msk [vmem:[#allocation3 + $0x20] sm:$0xff] %vm387_vm0, %v1760_v16  ;;  %393 = vst.msk [vmem:[#allocation3 + $0x28] sm:$0xff] %vm387_vm0, %v1760_v16 }
  0x3a   : > { %394 = vst.msk [vmem:[#allocation3 + $0x30] sm:$0xff] %vm387_vm0, %v1760_v16  ;;  %395 = vst.msk [vmem:[#allocation3 + $0x38] sm:$0xff] %vm387_vm0, %v1760_v16 }
  0x3b   : > { %396 = vst.msk [vmem:[#allocation3 + $0x40] sm:$0xff] %vm387_vm0, %v1760_v16  ;;  %397 = vst.msk [vmem:[#allocation3 + $0x48] sm:$0xff] %vm387_vm0, %v1760_v16 }
  0x3c   : > { %398 = vst.msk [vmem:[#allocation3 + $0x50] sm:$0xff] %vm387_vm0, %v1760_v16  ;;  %399 = vst.msk [vmem:[#allocation3 + $0x58] sm:$0xff] %vm387_vm0, %v1760_v16 }
  0x3d   : > { %400 = vst.msk [vmem:[#allocation3 + $0x60] sm:$0xff] %vm387_vm0, %v1760_v16  ;;  %401 = vst.msk [vmem:[#allocation3 + $0x68] sm:$0xff] %vm387_vm0, %v1760_v16 }
  0x3e   : > { %402 = vst.msk [vmem:[#allocation3 + $0x70] sm:$0xff] %vm387_vm0, %v1760_v16  ;;  %403 = vst.msk [vmem:[#allocation3 + $0x78] sm:$0xff] %vm387_vm0, %v1760_v16 }
  0x3f PF: > { %v452_v17 = vld [vmem:[%s1878_s8] sm:$0xff]  ;;  %v453_v18 = vld [vmem:[%s1878_s8 + $0x8] sm:$0xff]  ;;  %v454_v19 = vld [vmem:[%s1878_s8 + $0x10] sm:$0xff]  ;;  %vm709_vm1 = vcmask 7168   ;;  %p1248_p13 = scmp.ne.s32.totalorder %s1742_s20, 1 }
  0x40   : > { %v1548_v20 = vpack.c.bf16 %v453_v18, %v452_v17  ;;  %v455_v21 = vld [vmem:[%s1878_s8 + $0x18] sm:$0xff]  ;;  %v456_v23 = vld [vmem:[%s1878_s8 + $0x20] sm:$0xff]  ;;  %v457_v24 = vld [vmem:[%s1878_s8 + $0x28] sm:$0xff] }
  0x41   : > { %v1552_v22 = vpack.c.bf16 %v455_v21, %v454_v19  ;;  %v1556_v25 = vpack.c.bf16 %v457_v24, %v456_v23  ;;  %v1911_v26 = vld [vmem:[%s1885_s18] sm:$0xff]   ;;  %v458_v28 = vld [vmem:[%s1878_s8 + $0x30] sm:$0xff]  ;;  %v459_v29 = vld [vmem:[%s1878_s8 + $0x38] sm:$0xff] }
  0x42   : > { %1549 = vmatprep.subr.bf16.mxu0 %v1548_v20  ;;  %1612 = vmatprep.subr.bf16.mxu1 %v1548_v20  ;;  %v1914_v27 = vld [vmem:[%s1885_s18 + $0x20] sm:$0xff]   ;;  %v1288_v30 = vunpack.c.l.bf16 %v1911_v26  ;;  %v1921_v32 = vld [vmem:[%s1885_s18 + $0x8] sm:$0xff]   ;;  %v1560_v33 = vpack.c.bf16 %v459_v29, %v458_v28  ;;  %v1289_v38 = vunpack.c.h.bf16 %v1911_v26  ;;  %v462_v40 = vld [vmem:[%s1878_s8 + $0x50] sm:$0xff] }
  0x43   : > { %1551 = vmatpush3.bf16.msra.mxu0 %v1548_v20  ;;  %1620 = vmatpush3.bf16.msra.mxu1 %v1548_v20  ;;  %v1304_v31 = vunpack.c.l.bf16 %v1914_v27  ;;  %v1292_v34 = vunpack.c.l.bf16 %v1921_v32  ;;  %v460_v35 = vld [vmem:[%s1878_s8 + $0x40] sm:$0xff]  ;;  %v461_v36 = vld [vmem:[%s1878_s8 + $0x48] sm:$0xff]  ;;  %v1293_v39 = vunpack.c.h.bf16 %v1921_v32  ;;  %v463_v41 = vld [vmem:[%s1878_s8 + $0x58] sm:$0xff]  ;;  %v1305_v55 = vunpack.c.h.bf16 %v1914_v27 }
  0x44   : > { %1553 = vmatprep.subr.bf16.mxu0 %v1552_v22  ;;  %1613 = vmatprep.subr.bf16.mxu1 %v1552_v22  ;;  %v1564_v37 = vpack.c.bf16 %v461_v36, %v460_v35  ;;  %v1933_v42 = vld [vmem:[%s1885_s18 + $0x10] sm:$0xff]   ;;  %v1568_v43 = vpack.c.bf16 %v463_v41, %v462_v40  ;;  %v464_v46 = vld [vmem:[%s1878_s8 + $0x60] sm:$0xff]  ;;  %v465_v47 = vld [vmem:[%s1878_s8 + $0x68] sm:$0xff] }
  0x45   : > { %1468 = vmatprep.mubr.f32.mxu0 %v1288_v30  ;;  %1480 = vmatprep.mubr.f32.mxu1 %v1304_v31  ;;  %v1296_v44 = vunpack.c.l.bf16 %v1933_v42  ;;  %v1297_v45 = vunpack.c.h.bf16 %v1933_v42  ;;  %v1360_v48 = vld [vmem:[%s1885_s18 + $0x18] sm:$0xff]   ;;  %v1572_v49 = vpack.c.bf16 %v465_v47, %v464_v46  ;;  %v466_v52 = vld [vmem:[%s1878_s8 + $0x70] sm:$0xff]  ;;  %v1362_v56 = vld [vmem:[%s1885_s18 + $0x28] sm:$0xff]  }
  0x46   : > { %665 = vadd.xlane.f32.xlu1 %v1292_v34  ;;  %661 = vadd.xlane.f32.xlu0 %v1288_v30  ;;  %v1300_v50 = vunpack.c.l.bf16 %v1360_v48  ;;  %v1301_v51 = vunpack.c.h.bf16 %v1360_v48  ;;  %v467_v53 = vld [vmem:[%s1878_s8 + $0x78] sm:$0xff]  ;;  %v1308_v57 = vunpack.c.l.bf16 %v1362_v56  ;;  %v1309_v58 = vunpack.c.h.bf16 %v1362_v56  ;;  %v1363_v59 = vld [vmem:[%s1885_s18 + $0x30] sm:$0xff]   ;;  %v645_v2 = vld [vmem:[#allocation3] sm:$0xff] }
  0x47   : > { %1555 = vmatpush3.bf16.msra.mxu0 %v1552_v22  ;;  %1621 = vmatpush3.bf16.msra.mxu1 %v1552_v22  ;;  %v1576_v54 = vpack.c.bf16 %v467_v53, %v466_v52  ;;  %v1312_v60 = vunpack.c.l.bf16 %v1363_v59  ;;  %v1313_v61 = vunpack.c.h.bf16 %v1363_v59  ;;  %v1364_v62 = vld [vmem:[%s1885_s18 + $0x38] sm:$0xff]   ;;  %v647_v1 = vld [vmem:[#allocation3 + $0x10] sm:$0xff]  ;;  %v646_v8 = vld [vmem:[#allocation3 + $0x8] sm:$0xff] }
  0x48   : > { %1557 = vmatprep.subr.bf16.mxu0 %v1556_v25  ;;  %1614 = vmatprep.subr.bf16.mxu1 %v1556_v25  ;;  %v1316_v63 = vunpack.c.l.bf16 %v1364_v62  ;;  %v1317_v0 = vunpack.c.h.bf16 %v1364_v62  ;;  %v648_v7 = vld [vmem:[#allocation3 + $0x18] sm:$0xff]  ;;  %v650_v13 = vld [vmem:[#allocation3 + $0x28] sm:$0xff]  ;;  %v649_v14 = vld [vmem:[#allocation3 + $0x20] sm:$0xff] }
  0x49   : > { %v652_v19 = vld [vmem:[#allocation3 + $0x38] sm:$0xff]  ;;  %v651_v20 = vld [vmem:[#allocation3 + $0x30] sm:$0xff]  ;;  %v653_v26 = vld [vmem:[#allocation3 + $0x40] sm:$0xff] }
  0x4a   : > { %667 = vadd.xlane.f32.xlu1 %v1293_v39  ;;  %663 = vadd.xlane.f32.xlu0 %v1289_v38  ;;  %v655_v32 = vld [vmem:[#allocation3 + $0x50] sm:$0xff]  ;;  %v436_v52 = vld [vmem:[#allocation2] sm:$0xff]  ;;  %v447_v62 = vld [vmem:[#allocation2 + $0x58] sm:$0xff] }
  0x4b   : > { %1559 = vmatpush3.bf16.msra.mxu0 %v1556_v25  ;;  %1622 = vmatpush3.bf16.msra.mxu1 %v1556_v25  ;;  %v654_v25 = vld [vmem:[#allocation3 + $0x48] sm:$0xff] }
  0x4c   : > { %1561 = vmatprep.subr.bf16.mxu0 %v1560_v33  ;;  %1615 = vmatprep.subr.bf16.mxu1 %v1560_v33 }
  0x4e   : > { %671 = vadd.xlane.f32.xlu1 %v1297_v45  ;;  %669 = vadd.xlane.f32.xlu0 %v1296_v44 }
  0x4f   : > { %1563 = vmatpush3.bf16.msra.mxu0 %v1560_v33  ;;  %1623 = vmatpush3.bf16.msra.mxu1 %v1560_v33 }
  0x50   : > { %1565 = vmatprep.subr.bf16.mxu0 %v1564_v37  ;;  %1616 = vmatprep.subr.bf16.mxu1 %v1564_v37 }
  0x52   : > { %675 = vadd.xlane.f32.xlu1 %v1301_v51  ;;  %673 = vadd.xlane.f32.xlu0 %v1300_v50 }
  0x53   : > { %1567 = vmatpush3.bf16.msra.mxu0 %v1564_v37  ;;  %1624 = vmatpush3.bf16.msra.mxu1 %v1564_v37  ;;  %v658_v37 = vld [vmem:[#allocation3 + $0x68] sm:$0xff] }
  0x54   : > { %1569 = vmatprep.subr.bf16.mxu0 %v1568_v43  ;;  %1617 = vmatprep.subr.bf16.mxu1 %v1568_v43 }
  0x56   : > { %679 = vadd.xlane.f32.xlu1 %v1305_v55  ;;  %677 = vadd.xlane.f32.xlu0 %v1304_v31  ;;  %v656_v31 = vld [vmem:[#allocation3 + $0x58] sm:$0xff] }
  0x57   : > { %1571 = vmatpush3.bf16.msra.mxu0 %v1568_v43  ;;  %1625 = vmatpush3.bf16.msra.mxu1 %v1568_v43  ;;  %v660_v43 = vld [vmem:[#allocation3 + $0x78] sm:$0xff] }
  0x58   : > { %1573 = vmatprep.subr.bf16.mxu0 %v1572_v49  ;;  %1618 = vmatprep.subr.bf16.mxu1 %v1572_v49 }
  0x5a   : > { %683 = vadd.xlane.f32.xlu1 %v1309_v58  ;;  %681 = vadd.xlane.f32.xlu0 %v1308_v57 }
  0x5b   : > { %1575 = vmatpush3.bf16.msra.mxu0 %v1572_v49  ;;  %1626 = vmatpush3.bf16.msra.mxu1 %v1572_v49  ;;  %v437_v49 = vld [vmem:[#allocation2 + $0x8] sm:$0xff] }
  0x5c   : > { %1577 = vmatprep.subr.bf16.mxu0 %v1576_v54  ;;  %1619 = vmatprep.subr.bf16.mxu1 %v1576_v54 }
  0x5e   : > { %687 = vadd.xlane.f32.xlu1 %v1313_v61  ;;  %685 = vadd.xlane.f32.xlu0 %v1312_v60 }
  0x5f   : > { %1579 = vmatpush3.bf16.msra.mxu0 %v1576_v54  ;;  %1627 = vmatpush3.bf16.msra.mxu1 %v1576_v54 }
  0x62   : > { %1469 = vmatmul.mubr.f32.vlgmr.msra.gmra.mrb[0].mxu0 %v1289_v38  ;;  %1481 = vmatmul.mubr.f32.vlgmr.msra.gmra.mrb[0].mxu1 %v1305_v55  ;;  %v657_v38 = vld [vmem:[#allocation3 + $0x60] sm:$0xff] }
  0x63   : > { %1471 = vmatprep.mubr.f32.mxu0 %v1292_v34  ;;  %1483 = vmatprep.mubr.f32.mxu1 %v1308_v57 }
  0x64   : > { %691 = vadd.xlane.f32.xlu1 %v1317_v0  ;;  %689 = vadd.xlane.f32.xlu0 %v1316_v63 }
  0x66   : > { %1472 = vmatmul.mubr.f32.gmra.mrb[2].mxu0 %v1293_v39  ;;  %1484 = vmatmul.mubr.f32.gmra.mrb[2].mxu1 %v1309_v58 }
  0x67   : > { %1474 = vmatprep.mubr.f32.mxu0 %v1296_v44  ;;  %1486 = vmatprep.mubr.f32.mxu1 %v1312_v60  ;;  %v659_v44 = vld [vmem:[#allocation3 + $0x70] sm:$0xff] }
  0x6a   : > { %1475 = vmatmul.mubr.f32.gmra.mrb[4].mxu0 %v1297_v45  ;;  %1487 = vmatmul.mubr.f32.gmra.mrb[4].mxu1 %v1313_v61  ;;  %v439_v61 = vld [vmem:[#allocation2 + $0x18] sm:$0xff] }
  0x6b   : > { %1477 = vmatprep.mubr.f32.mxu0 %v1300_v50  ;;  %1489 = vmatprep.mubr.f32.mxu1 %v1316_v63  ;;  %v445_v50 = vld [vmem:[#allocation2 + $0x48] sm:$0xff]  ;;  %v446_v63 = vld [vmem:[#allocation2 + $0x50] sm:$0xff] }
  0x6e   : > { %1478 = vmatmul.mubr.f32.gmra.mrb[6].mxu0 %v1301_v51  ;;  %1490 = vmatmul.mubr.f32.gmra.mrb[6].mxu1 %v1317_v0  ;;  %v444_v51 = vld [vmem:[#allocation2 + $0x40] sm:$0xff]  ;;  %v438_v0 = vld [vmem:[#allocation2 + $0x10] sm:$0xff] }
  0xd3   : > { %v666_v3 = vpop.xlane.xlu1 %665  ;;  %v662_v4 = vpop.xlane.xlu0 %661 }
  0xd4   : > { %v695_v5 = vadd.f32 %v666_v3, %v647_v1  ;;  %v693_v6 = vadd.f32 %v662_v4, %v645_v2 }
  0xd6   : > { %712 = vst.msk [vmem:[#allocation3 + $0x10] sm:$0xff] %vm709_vm1, %v695_v5  ;;  %710 = vst.msk [vmem:[#allocation3] sm:$0xff] %vm709_vm1, %v693_v6 }
  0xd7   : > { %v668_v9 = vpop.xlane.xlu1 %667  ;;  %v664_v10 = vpop.xlane.xlu0 %663 }
  0xd8   : > { %v696_v11 = vadd.f32 %v668_v9, %v648_v7  ;;  %v694_v12 = vadd.f32 %v664_v10, %v646_v8  ;;  %v441_v9 = vld [vmem:[#allocation2 + $0x28] sm:$0xff] }
  0xd9   : > { %v449_v10 = vld [vmem:[#allocation2 + $0x68] sm:$0xff] }
  0xda   : > { %713 = vst.msk [vmem:[#allocation3 + $0x18] sm:$0xff] %vm709_vm1, %v696_v11  ;;  %711 = vst.msk [vmem:[#allocation3 + $0x8] sm:$0xff] %vm709_vm1, %v694_v12  ;;  %v448_v11 = vld [vmem:[#allocation2 + $0x60] sm:$0xff] }
  0xdb   : > { %v672_v15 = vpop.xlane.xlu1 %671  ;;  %v670_v16 = vpop.xlane.xlu0 %669  ;;  %v440_v12 = vld [vmem:[#allocation2 + $0x20] sm:$0xff] }
  0xdc   : > { %v698_v17 = vadd.f32 %v672_v15, %v650_v13  ;;  %v697_v18 = vadd.f32 %v670_v16, %v649_v14 }
  0xde   : > { %715 = vst.msk [vmem:[#allocation3 + $0x28] sm:$0xff] %vm709_vm1, %v698_v17  ;;  %714 = vst.msk [vmem:[#allocation3 + $0x20] sm:$0xff] %vm709_vm1, %v697_v18 }
  0xdf   : > { %v676_v21 = vpop.xlane.xlu1 %675  ;;  %v674_v22 = vpop.xlane.xlu0 %673 }
  0xe0   : > { %v700_v23 = vadd.f32 %v676_v21, %v652_v19  ;;  %v699_v24 = vadd.f32 %v674_v22, %v651_v20  ;;  %v443_v21 = vld [vmem:[#allocation2 + $0x38] sm:$0xff] }
  0xe1   : > { %v451_v22 = vld [vmem:[#allocation2 + $0x78] sm:$0xff] }
  0xe2   : > { %717 = vst.msk [vmem:[#allocation3 + $0x38] sm:$0xff] %vm709_vm1, %v700_v23  ;;  %716 = vst.msk [vmem:[#allocation3 + $0x30] sm:$0xff] %vm709_vm1, %v699_v24  ;;  %v450_v23 = vld [vmem:[#allocation2 + $0x70] sm:$0xff] }
  0xe3   : > { %v680_v27 = vpop.xlane.xlu1 %679  ;;  %v678_v28 = vpop.xlane.xlu0 %677  ;;  %v442_v24 = vld [vmem:[#allocation2 + $0x30] sm:$0xff] }
  0xe4   : > { %v702_v29 = vadd.f32 %v680_v27, %v654_v25  ;;  %v701_v30 = vadd.f32 %v678_v28, %v653_v26 }
  0xe6   : > { %719 = vst.msk [vmem:[#allocation3 + $0x48] sm:$0xff] %vm709_vm1, %v702_v29  ;;  %718 = vst.msk [vmem:[#allocation3 + $0x40] sm:$0xff] %vm709_vm1, %v701_v30 }
  0xe7   : > { %v684_v33 = vpop.xlane.xlu1 %683  ;;  %v682_v34 = vpop.xlane.xlu0 %681 }
  0xe8   : > { %v704_v35 = vadd.f32 %v684_v33, %v656_v31  ;;  %v703_v36 = vadd.f32 %v682_v34, %v655_v32  ;;  %v746_v33 = vld [vmem:[%s2086_s2] sm:$0xff] (!%p1248_p13)  ;;  %v747_v34 = vld [vmem:[%s2086_s2 + $0x8] sm:$0xff] (!%p1248_p13) }
  0xea   : > { %721 = vst.msk [vmem:[#allocation3 + $0x58] sm:$0xff] %vm709_vm1, %v704_v35  ;;  %720 = vst.msk [vmem:[#allocation3 + $0x50] sm:$0xff] %vm709_vm1, %v703_v36  ;;  %v748_v35 = vld [vmem:[%s2086_s2 + $0x10] sm:$0xff] (!%p1248_p13)  ;;  %v1580_v36 = vpack.c.bf16 (!%p1248_p13), %v747_v34, %v746_v33 }
  0xeb   : > { %v688_v39 = vpop.xlane.xlu1 %687  ;;  %v686_v40 = vpop.xlane.xlu0 %685 }
  0xec   : > { %v706_v41 = vadd.f32 %v688_v39, %v658_v37  ;;  %v705_v42 = vadd.f32 %v686_v40, %v657_v38  ;;  %v749_v37 = vld [vmem:[%s2086_s2 + $0x18] sm:$0xff] (!%p1248_p13)  ;;  %v1761_v38 = vmov (!%p1248_p13), 0   ;;  %v750_v40 = vld [vmem:[%s2086_s2 + $0x20] sm:$0xff] (!%p1248_p13)  ;;  %1581 = vmatprep.subr.bf16.mxu0 (!%p1248_p13), %v1580_v36  ;;  %1628 = vmatprep.subr.bf16.mxu1 (!%p1248_p13), %v1580_v36 }
  0xed   : > { %1703 = vset.pattern.permute.xlu1 (!%p1248_p13), %v1761_v38  ;;  %1702 = vset.pattern.permute.xlu0 (!%p1248_p13), %v1761_v38  ;;  %v1584_v39 = vpack.c.bf16 (!%p1248_p13), %v749_v37, %v748_v35  ;;  %v2016_v38 = vld [vmem:[%s2087_s3] ss:$0 sm:$0xff] (!%p1248_p13) }
  0xee   : > { %723 = vst.msk [vmem:[#allocation3 + $0x68] sm:$0xff] %vm709_vm1, %v706_v41  ;;  %722 = vst.msk [vmem:[#allocation3 + $0x60] sm:$0xff] %vm709_vm1, %v705_v42  ;;  %v751_v41 = vld [vmem:[%s2086_s2 + $0x28] sm:$0xff] (!%p1248_p13)  ;;  %1583 = vmatpush3.bf16.msra.mxu0 (!%p1248_p13), %v1580_v36  ;;  %1636 = vmatpush3.bf16.msra.mxu1 (!%p1248_p13), %v1580_v36 }
  0xef   : > { %1585 = vmatprep.subr.bf16.mxu0 (!%p1248_p13), %v1584_v39  ;;  %1629 = vmatprep.subr.bf16.mxu1 (!%p1248_p13), %v1584_v39  ;;  %v1588_v42 = vpack.c.bf16 (!%p1248_p13), %v751_v41, %v750_v40 }
  0xf1   : > { %v692_v45 = vpop.xlane.xlu1 %691  ;;  %v690_v46 = vpop.xlane.xlu0 %689 }
  0xf2   : > { %v708_v47 = vadd.f32 %v692_v45, %v660_v43  ;;  %v707_v48 = vadd.f32 %v690_v46, %v659_v44  ;;  %v752_v45 = vld [vmem:[%s2086_s2 + $0x30] sm:$0xff] (!%p1248_p13)  ;;  %v753_v46 = vld [vmem:[%s2086_s2 + $0x38] sm:$0xff] (!%p1248_p13)  ;;  %1587 = vmatpush3.bf16.msra.mxu0 (!%p1248_p13), %v1584_v39  ;;  %1637 = vmatpush3.bf16.msra.mxu1 (!%p1248_p13), %v1584_v39 }
  0xf3   : > { %1589 = vmatprep.subr.bf16.mxu0 (!%p1248_p13), %v1588_v42  ;;  %1630 = vmatprep.subr.bf16.mxu1 (!%p1248_p13), %v1588_v42 }
  0xf4   : > { %725 = vst.msk [vmem:[#allocation3 + $0x78] sm:$0xff] %vm709_vm1, %v708_v47  ;;  %724 = vst.msk [vmem:[#allocation3 + $0x70] sm:$0xff] %vm709_vm1, %v707_v48  ;;  %v1592_v47 = vpack.c.bf16 (!%p1248_p13), %v753_v46, %v752_v45  ;;  %v754_v48 = vld [vmem:[%s2086_s2 + $0x40] sm:$0xff] (!%p1248_p13) }
  0xf5   : > { %v2025_v46 = vld [vmem:[%s2088_s4] ss:$0 sm:$0xff] (!%p1248_p13) }
  0xf6   : > { %1591 = vmatpush3.bf16.msra.mxu0 (!%p1248_p13), %v1588_v42  ;;  %1638 = vmatpush3.bf16.msra.mxu1 (!%p1248_p13), %v1588_v42 }
  0xf7   : > { %1593 = vmatprep.subr.bf16.mxu0 (!%p1248_p13), %v1592_v47  ;;  %1631 = vmatprep.subr.bf16.mxu1 (!%p1248_p13), %v1592_v47 }
  0xfa   : > { %1595 = vmatpush3.bf16.msra.mxu0 (!%p1248_p13), %v1592_v47  ;;  %1639 = vmatpush3.bf16.msra.mxu1 (!%p1248_p13), %v1592_v47 }
 0x135   : > { %v1470_v53 = vpop.f32.mrb[0].mxu0  ;;  %v1482_v54 = vpop.f32.mrb[0].mxu1 }
 0x136   : > { %v614_v55 = vadd.f32 %v1470_v53, %v437_v49  ;;  %v622_v56 = vadd.f32 %v1482_v54, %v445_v50  ;;  %v574_v57 = vpop.f32.mrb[1].mxu1  ;;  %v534_v58 = vpop.f32.mrb[1].mxu0  ;;  %v755_v49 = vld [vmem:[%s2086_s2 + $0x48] sm:$0xff] (!%p1248_p13)  ;;  %v764_v50 = vld [vmem:[#allocation3 + $0x10] sm:$0xff] (!%p1248_p13) }
 0x137   : > { %v621_v59 = vadd.f32 %v574_v57, %v444_v51  ;;  %v613_v60 = vadd.f32 %v534_v58, %v436_v52  ;;  %791 = vperm.xlu1 (!%p1248_p13), %1703, %v764_v50   ;;  %v762_v51 = vld [vmem:[#allocation3] sm:$0xff] (!%p1248_p13)  ;;  %v765_v52 = vld [vmem:[#allocation3 + $0x18] sm:$0xff] (!%p1248_p13)  ;;  %v1596_v53 = vpack.c.bf16 (!%p1248_p13), %v755_v49, %v754_v48  ;;  %v756_v54 = vld [vmem:[%s2086_s2 + $0x50] sm:$0xff] (!%p1248_p13) }
 0x138   : > { %630 = vst [vmem:[#allocation2 + $0x8] sm:$0xff] %v614_v55  ;;  %638 = vst [vmem:[#allocation2 + $0x48] sm:$0xff] %v622_v56  ;;  %v757_v55 = vld [vmem:[%s2086_s2 + $0x58] sm:$0xff] (!%p1248_p13)  ;;  %781 = vperm.xlu0 (!%p1248_p13), %1702, %v762_v51   ;;  %v763_v56 = vld [vmem:[#allocation3 + $0x8] sm:$0xff] (!%p1248_p13) }
 0x139   : > { %637 = vst [vmem:[#allocation2 + $0x40] sm:$0xff] %v621_v59  ;;  %629 = vst [vmem:[#allocation2] sm:$0xff] %v613_v60  ;;  %v1473_v1 = vpop.f32.mrb[2].mxu0  ;;  %v1485_v2 = vpop.f32.mrb[2].mxu1  ;;  %v767_v57 = vld [vmem:[#allocation3 + $0x28] sm:$0xff] (!%p1248_p13)  ;;  %1597 = vmatprep.subr.bf16.mxu0 (!%p1248_p13), %v1596_v53  ;;  %1632 = vmatprep.subr.bf16.mxu1 (!%p1248_p13), %v1596_v53  ;;  %v1600_v58 = vpack.c.bf16 (!%p1248_p13), %v757_v55, %v756_v54  ;;  %v758_v59 = vld [vmem:[%s2086_s2 + $0x60] sm:$0xff] (!%p1248_p13) }
 0x13a   : > { %v616_v3 = vadd.f32 %v1473_v1, %v439_v61  ;;  %v624_v4 = vadd.f32 %v1485_v2, %v447_v62  ;;  %v584_v5 = vpop.f32.mrb[3].mxu1  ;;  %v544_v6 = vpop.f32.mrb[3].mxu0  ;;  %v759_v60 = vld [vmem:[%s2086_s2 + $0x68] sm:$0xff] (!%p1248_p13)  ;;  %v766_v61 = vld [vmem:[#allocation3 + $0x20] sm:$0xff] (!%p1248_p13)  ;;  %1599 = vmatpush3.bf16.msra.mxu0 (!%p1248_p13), %v1596_v53  ;;  %1640 = vmatpush3.bf16.msra.mxu1 (!%p1248_p13), %v1596_v53  ;;  %v769_v62 = vld [vmem:[#allocation3 + $0x38] sm:$0xff] (!%p1248_p13) }
 0x13b   : > { %v623_v7 = vadd.f32 %v584_v5, %v446_v63  ;;  %v615_v8 = vadd.f32 %v544_v6, %v438_v0  ;;  %796 = vperm.xlu1 (!%p1248_p13), %1703, %v765_v52   ;;  %1601 = vmatprep.subr.bf16.mxu0 (!%p1248_p13), %v1600_v58  ;;  %v1604_v63 = vpack.c.bf16 (!%p1248_p13), %v759_v60, %v758_v59  ;;  %v760_v0 = vld [vmem:[%s2086_s2 + $0x70] sm:$0xff] (!%p1248_p13)  ;;  %v761_v1 = vld [vmem:[%s2086_s2 + $0x78] sm:$0xff] (!%p1248_p13)  ;;  %v770_v5 = vld [vmem:[#allocation3 + $0x40] sm:$0xff] (!%p1248_p13) }
 0x13c   : > { %632 = vst [vmem:[#allocation2 + $0x18] sm:$0xff] %v616_v3  ;;  %640 = vst [vmem:[#allocation2 + $0x58] sm:$0xff] %v624_v4  ;;  %786 = vperm.xlu0 (!%p1248_p13), %1702, %v763_v56   ;;  %1633 = vmatprep.subr.bf16.mxu1 (!%p1248_p13), %v1600_v58  ;;  %v768_v2 = vld [vmem:[#allocation3 + $0x30] sm:$0xff] (!%p1248_p13)  ;;  %v771_v3 = vld [vmem:[#allocation3 + $0x48] sm:$0xff] (!%p1248_p13)  ;;  %v1608_v4 = vpack.c.bf16 (!%p1248_p13), %v761_v1, %v760_v0 }
 0x13d   : > { %639 = vst [vmem:[#allocation2 + $0x50] sm:$0xff] %v623_v7  ;;  %631 = vst [vmem:[#allocation2 + $0x10] sm:$0xff] %v615_v8  ;;  %v1476_v13 = vpop.f32.mrb[4].mxu0  ;;  %v1488_v14 = vpop.f32.mrb[4].mxu1  ;;  %v773_v6 = vld [vmem:[#allocation3 + $0x58] sm:$0xff] (!%p1248_p13)  ;;  %v772_v7 = vld [vmem:[#allocation3 + $0x50] sm:$0xff] (!%p1248_p13) }
 0x13e   : > { %v618_v15 = vadd.f32 %v1476_v13, %v441_v9  ;;  %v626_v16 = vadd.f32 %v1488_v14, %v449_v10  ;;  %v594_v17 = vpop.f32.mrb[5].mxu1  ;;  %v554_v18 = vpop.f32.mrb[5].mxu0  ;;  %1603 = vmatpush3.bf16.msra.mxu0 (!%p1248_p13), %v1600_v58  ;;  %1641 = vmatpush3.bf16.msra.mxu1 (!%p1248_p13), %v1600_v58  ;;  %v774_v13 = vld [vmem:[#allocation3 + $0x60] sm:$0xff] (!%p1248_p13) }
 0x13f   : > { %v625_v19 = vadd.f32 %v594_v17, %v448_v11  ;;  %v617_v20 = vadd.f32 %v554_v18, %v440_v12  ;;  %729 = sbr.rel (%p1248_p13) target bundleno = 564 (0x234), region = 89  ;;  %806 = vperm.xlu1 (!%p1248_p13), %1703, %v767_v57   ;;  %1605 = vmatprep.subr.bf16.mxu0 (!%p1248_p13), %v1604_v63  ;;  %v731_v8 = vld [vmem:[#allocation2 + $0x8] sm:$0xff] (!%p1248_p13)  ;;  %v777_v18 = vld [vmem:[#allocation3 + $0x78] sm:$0xff] (!%p1248_p13) }
 0x140   : > { %634 = vst [vmem:[#allocation2 + $0x28] sm:$0xff] %v618_v15  ;;  %642 = vst [vmem:[#allocation2 + $0x68] sm:$0xff] %v626_v16  ;;  %v730_v43 = vld [vmem:[#allocation2] sm:$0xff] (!%p1248_p13)  ;;  %801 = vperm.xlu0 (!%p1248_p13), %1702, %v766_v61   ;;  %1634 = vmatprep.subr.bf16.mxu1 (!%p1248_p13), %v1604_v63  ;;  %v739_v9 = vld [vmem:[#allocation2 + $0x48] sm:$0xff] (!%p1248_p13) }
 0x141   : > { %641 = vst [vmem:[#allocation2 + $0x60] sm:$0xff] %v625_v19  ;;  %633 = vst [vmem:[#allocation2 + $0x20] sm:$0xff] %v617_v20  ;;  %v1479_v25 = vpop.f32.mrb[6].mxu0  ;;  %v1491_v26 = vpop.f32.mrb[6].mxu1  ;;  %v738_v44 = vld [vmem:[#allocation2 + $0x40] sm:$0xff] (!%p1248_p13)  ;;  %1524 = vmatprep.mubr.f32.mxu0 (!%p1248_p13), %v730_v43  ;;  %v775_v12 = vld [vmem:[#allocation3 + $0x68] sm:$0xff] (!%p1248_p13) }
 0x142   : > { %v620_v27 = vadd.f32 %v1479_v25, %v443_v21  ;;  %v628_v28 = vadd.f32 %v1491_v26, %v451_v22  ;;  %v604_v29 = vpop.f32.mrb[7].mxu1  ;;  %v564_v30 = vpop.f32.mrb[7].mxu0  ;;  %1536 = vmatprep.mubr.f32.mxu1 (!%p1248_p13), %v738_v44  ;;  %1607 = vmatpush3.bf16.msra.mxu0 (!%p1248_p13), %v1604_v63  ;;  %v776_v19 = vld [vmem:[#allocation3 + $0x70] sm:$0xff] (!%p1248_p13) }
 0x143   : > { %v627_v31 = vadd.f32 %v604_v29, %v450_v23  ;;  %v619_v32 = vadd.f32 %v564_v30, %v442_v24  ;;  %816 = vperm.xlu1 (!%p1248_p13), %1703, %v769_v62   ;;  %1642 = vmatpush3.bf16.msra.mxu1 (!%p1248_p13), %v1604_v63  ;;  %v733_v14 = vld [vmem:[#allocation2 + $0x18] sm:$0xff] (!%p1248_p13) }
 0x144   : > { %636 = vst [vmem:[#allocation2 + $0x38] sm:$0xff] %v620_v27  ;;  %644 = vst [vmem:[#allocation2 + $0x78] sm:$0xff] %v628_v28  ;;  %811 = vperm.xlu0 (!%p1248_p13), %1702, %v768_v2   ;;  %1609 = vmatprep.subr.bf16.mxu0 (!%p1248_p13), %v1608_v4  ;;  %v732_v10 = vld [vmem:[#allocation2 + $0x10] sm:$0xff] (!%p1248_p13)  ;;  %v741_v15 = vld [vmem:[#allocation2 + $0x58] sm:$0xff] (!%p1248_p13) }
 0x145   : > { %643 = vst [vmem:[#allocation2 + $0x70] sm:$0xff] %v627_v31  ;;  %635 = vst [vmem:[#allocation2 + $0x30] sm:$0xff] %v619_v32  ;;  %1635 = vmatprep.subr.bf16.mxu1 (!%p1248_p13), %v1608_v4  ;;  %v740_v11 = vld [vmem:[#allocation2 + $0x50] sm:$0xff] (!%p1248_p13) }
 0x146   : > { %1611 = vmatpush3.bf16.msra.mxu0 %v1608_v4 }
 0x147   : > { %826 = vperm.xlu1 %1703, %v771_v3   ;;  %1643 = vmatpush3.bf16.msra.mxu1 %v1608_v4  ;;  %v735_v20 = vld [vmem:[#allocation2 + $0x28] sm:$0xff] }
 0x148   : > { %821 = vperm.xlu0 %1702, %v770_v5   ;;  %v734_v16 = vld [vmem:[#allocation2 + $0x20] sm:$0xff]  ;;  %v743_v21 = vld [vmem:[#allocation2 + $0x68] sm:$0xff] }
 0x149   : > { %1525 = vmatmul.mubr.f32.vlgmr.msra.gmra.mrb[0].mxu0 %v731_v8  ;;  %v742_v17 = vld [vmem:[#allocation2 + $0x60] sm:$0xff] }
 0x14a   : > { %1537 = vmatmul.mubr.f32.vlgmr.msra.gmra.mrb[0].mxu1 %v739_v9  ;;  %1527 = vmatprep.mubr.f32.mxu0 %v732_v10 }
 0x14b   : > { %836 = vperm.xlu1 %1703, %v773_v6   ;;  %1539 = vmatprep.mubr.f32.mxu1 %v740_v11  ;;  %v737_v24 = vld [vmem:[#allocation2 + $0x38] sm:$0xff] }
 0x14c   : > { %831 = vperm.xlu0 %1702, %v772_v7   ;;  %v736_v22 = vld [vmem:[#allocation2 + $0x30] sm:$0xff]  ;;  %v745_v25 = vld [vmem:[#allocation2 + $0x78] sm:$0xff] }
 0x14d   : > { %1528 = vmatmul.mubr.f32.gmra.mrb[2].mxu0 %v733_v14  ;;  %v744_v23 = vld [vmem:[#allocation2 + $0x70] sm:$0xff] }
 0x14e   : > { %1540 = vmatmul.mubr.f32.gmra.mrb[2].mxu1 %v741_v15  ;;  %1530 = vmatprep.mubr.f32.mxu0 %v734_v16 }
 0x14f   : > { %846 = vperm.xlu1 %1703, %v775_v12   ;;  %1542 = vmatprep.mubr.f32.mxu1 %v742_v17 }
 0x150   : > { %841 = vperm.xlu0 %1702, %v774_v13  }
 0x151   : > { %1531 = vmatmul.mubr.f32.gmra.mrb[4].mxu0 %v735_v20 }
 0x152   : > { %1543 = vmatmul.mubr.f32.gmra.mrb[4].mxu1 %v743_v21  ;;  %1533 = vmatprep.mubr.f32.mxu0 %v736_v22 }
 0x153   : > { %856 = vperm.xlu1 %1703, %v777_v18   ;;  %1545 = vmatprep.mubr.f32.mxu1 %v744_v23 }
 0x154   : > { %851 = vperm.xlu0 %1702, %v776_v19  }
 0x155   : > { %1534 = vmatmul.mubr.f32.gmra.mrb[6].mxu0 %v737_v24 }
 0x156   : > { %1546 = vmatmul.mubr.f32.gmra.mrb[6].mxu1 %v745_v25 }
 0x1b6   : > { %v792_v26 = vpop.permute.xlu1 %791 }
 0x1b7   : > { %v782_v27 = vpop.permute.xlu0 %781  ;;  %v867_v48 = vmul.f32 %v2016_v38, %v792_v26 }
 0x1b8   : > { %v865_v43 = vmul.f32 %v2016_v38, %v782_v27 }
 0x1ba   : > { %v797_v28 = vpop.permute.xlu1 %796 }
 0x1bb   : > { %v787_v29 = vpop.permute.xlu0 %786  ;;  %v868_v49 = vmul.f32 %v2016_v38, %v797_v28 }
 0x1bc   : > { %v866_v39 = vmul.f32 %v2016_v38, %v787_v29 }
 0x1be   : > { %v807_v30 = vpop.permute.xlu1 %806 }
 0x1bf   : > { %v802_v31 = vpop.permute.xlu0 %801  ;;  %v870_v54 = vmul.f32 %v2016_v38, %v807_v30 }
 0x1c0   : > { %v869_v55 = vmul.f32 %v2016_v38, %v802_v31 }
 0x1c2   : > { %v817_v32 = vpop.permute.xlu1 %816 }
 0x1c3   : > { %v812_v33 = vpop.permute.xlu0 %811  ;;  %v872_v58 = vmul.f32 %v2016_v38, %v817_v32 }
 0x1c4   : > { %v871_v62 = vmul.f32 %v2016_v38, %v812_v33 }
 0x1c6   : > { %v827_v34 = vpop.permute.xlu1 %826 }
 0x1c7   : > { %v822_v35 = vpop.permute.xlu0 %821  ;;  %v874_v40 = vmul.f32 %v2016_v38, %v827_v34 }
 0x1c8   : > { %v873_v44 = vmul.f32 %v2016_v38, %v822_v35 }
 0x1ca   : > { %v837_v36 = vpop.permute.xlu1 %836 }
 0x1cb   : > { %v832_v37 = vpop.permute.xlu0 %831  ;;  %v876_v59 = vmul.f32 %v2016_v38, %v837_v36 }
 0x1cc   : > { %v875_v63 = vmul.f32 %v2016_v38, %v832_v37 }
 0x1ce   : > { %v847_v41 = vpop.permute.xlu1 %846 }
 0x1cf   : > { %v842_v42 = vpop.permute.xlu0 %841  ;;  %v878_v14 = vmul.f32 %v2016_v38, %v847_v41 }
 0x1d0   : > { %v877_v15 = vmul.f32 %v2016_v38, %v842_v42 }
 0x1d2   : > { %v857_v16 = vpop.permute.xlu1 %856 }
 0x1d3   : > { %v852_v17 = vpop.permute.xlu0 %851  ;;  %v880_v36 = vmul.f32 %v2016_v38, %v857_v16 }
 0x1d4   : > { %v879_v37 = vmul.f32 %v2016_v38, %v852_v17 }
 0x21c   : > { %v1526_v45 = vpop.f32.mrb[0].mxu0 }
 0x21d   : > { %v1538_v47 = vpop.f32.mrb[0].mxu1  ;;  %v953_v50 = vadd.f32 %v1526_v45, %v866_v39  ;;  %v947_v52 = vpop.f32.mrb[1].mxu0 }
 0x21e   : > { %v993_v51 = vadd.f32 %v1538_v47, %v874_v40  ;;  %v987_v53 = vpop.f32.mrb[1].mxu1  ;;  %v948_v56 = vadd.f32 %v947_v52, %v865_v43 }
 0x21f   : > { %v988_v57 = vadd.f32 %v987_v53, %v873_v44  ;;  %v1034_v60 = vadd.f32 %v2025_v46, %v953_v50 }
 0x220   : > { %v1042_v61 = vadd.f32 %v2025_v46, %v993_v51  ;;  %v1033_v0 = vadd.f32 %v2025_v46, %v948_v56  ;;  %v1529_v2 = vpop.f32.mrb[2].mxu0 }
 0x221   : > { %v1041_v1 = vadd.f32 %v2025_v46, %v988_v57  ;;  %v1541_v3 = vpop.f32.mrb[2].mxu1  ;;  %v1050_v4 = vmax.f32 %v1034_v60, 0.0  ;;  %v963_v6 = vadd.f32 %v1529_v2, %v868_v49  ;;  %v957_v8 = vpop.f32.mrb[3].mxu0 }
 0x222   : > { %v1058_v5 = vmax.f32 %v1042_v61, 0.0  ;;  %v1003_v7 = vadd.f32 %v1541_v3, %v876_v59  ;;  %v997_v9 = vpop.f32.mrb[3].mxu1  ;;  %v1049_v10 = vmax.f32 %v1033_v0, 0.0  ;;  %v958_v12 = vadd.f32 %v957_v8, %v867_v48 }
 0x223   : > { %v1057_v11 = vmax.f32 %v1041_v1, 0.0  ;;  %v998_v13 = vadd.f32 %v997_v9, %v875_v63  ;;  %v1036_v18 = vadd.f32 %v2025_v46, %v963_v6 }
 0x224   : > { %v1044_v19 = vadd.f32 %v2025_v46, %v1003_v7  ;;  %v1321_v20 = vpack.c.bf16 %v1050_v4, %v1049_v10  ;;  %v1035_v22 = vadd.f32 %v2025_v46, %v958_v12  ;;  %v1532_v24 = vpop.f32.mrb[4].mxu0 }
 0x225   : > { %v1341_v21 = vpack.c.bf16 %v1058_v5, %v1057_v11  ;;  %v1043_v23 = vadd.f32 %v2025_v46, %v998_v13  ;;  %v1544_v25 = vpop.f32.mrb[4].mxu1  ;;  %v1052_v26 = vmax.f32 %v1036_v18, 0.0  ;;  %v973_v28 = vadd.f32 %v1532_v24, %v870_v54  ;;  %v967_v30 = vpop.f32.mrb[5].mxu0 }
 0x226   : > { %v1060_v27 = vmax.f32 %v1044_v19, 0.0  ;;  %v1013_v29 = vadd.f32 %v1544_v25, %v878_v14  ;;  %v1007_v31 = vpop.f32.mrb[5].mxu1  ;;  %1322 = vst [vmem:[%s1883_s12] sm:$0xff] %v1321_v20   ;;  %v1051_v32 = vmax.f32 %v1035_v22, 0.0  ;;  %v968_v34 = vadd.f32 %v967_v30, %v869_v55 }
 0x227   : > { %1368 = vst [vmem:[%s1883_s12 + $0x20] sm:$0xff] %v1341_v21   ;;  %v1059_v33 = vmax.f32 %v1043_v23, 0.0  ;;  %v1008_v35 = vadd.f32 %v1007_v31, %v877_v15  ;;  %v1038_v39 = vadd.f32 %v2025_v46, %v973_v28 }
 0x228   : > { %v1046_v40 = vadd.f32 %v2025_v46, %v1013_v29  ;;  %v1326_v41 = vpack.c.bf16 %v1052_v26, %v1051_v32  ;;  %v1037_v43 = vadd.f32 %v2025_v46, %v968_v34  ;;  %v1535_v45 = vpop.f32.mrb[6].mxu0 }
 0x229   : > { %v1346_v42 = vpack.c.bf16 %v1060_v27, %v1059_v33  ;;  %v1045_v44 = vadd.f32 %v2025_v46, %v1008_v35  ;;  %v1547_v47 = vpop.f32.mrb[6].mxu1  ;;  %v1054_v48 = vmax.f32 %v1038_v39, 0.0  ;;  %v983_v50 = vadd.f32 %v1535_v45, %v872_v58  ;;  %v977_v52 = vpop.f32.mrb[7].mxu0 }
 0x22a   : > { %v1062_v49 = vmax.f32 %v1046_v40, 0.0  ;;  %v1023_v51 = vadd.f32 %v1547_v47, %v880_v36  ;;  %v1017_v38 = vpop.f32.mrb[7].mxu1  ;;  %1365 = vst [vmem:[%s1883_s12 + $0x8] sm:$0xff] %v1326_v41   ;;  %v1053_v53 = vmax.f32 %v1037_v43, 0.0  ;;  %v978_v55 = vadd.f32 %v977_v52, %v871_v62 }
 0x22b   : > { %1369 = vst [vmem:[%s1883_s12 + $0x28] sm:$0xff] %v1346_v42   ;;  %v1061_v54 = vmax.f32 %v1045_v44, 0.0  ;;  %v1018_v56 = vadd.f32 %v1017_v38, %v879_v37  ;;  %v1040_v57 = vadd.f32 %v2025_v46, %v983_v50 }
 0x22c   : > { %v1048_v59 = vadd.f32 %v2025_v46, %v1023_v51  ;;  %v1331_v60 = vpack.c.bf16 %v1054_v48, %v1053_v53  ;;  %v1039_v58 = vadd.f32 %v2025_v46, %v978_v55 }
 0x22d   : > { %v1351_v61 = vpack.c.bf16 %v1062_v49, %v1061_v54  ;;  %v1047_v63 = vadd.f32 %v2025_v46, %v1018_v56  ;;  %v1056_v0 = vmax.f32 %v1040_v57, 0.0 }
 0x22e   : > { %v1064_v1 = vmax.f32 %v1048_v59, 0.0  ;;  %1366 = vst [vmem:[%s1883_s12 + $0x10] sm:$0xff] %v1331_v60   ;;  %v1055_v2 = vmax.f32 %v1039_v58, 0.0 }
 0x22f   : > { %1370 = vst [vmem:[%s1883_s12 + $0x30] sm:$0xff] %v1351_v61   ;;  %v1063_v3 = vmax.f32 %v1047_v63, 0.0 }
 0x230   : > { %v1336_v62 = vpack.c.bf16 %v1056_v0, %v1055_v2 }
 0x231   : > { %v1356_v4 = vpack.c.bf16 %v1064_v1, %v1063_v3 }
 0x232   : > { %1367 = vst [vmem:[%s1883_s12 + $0x18] sm:$0xff] %v1336_v62  }
 0x233   : > { %1371 = vst [vmem:[%s1883_s12 + $0x38] sm:$0xff] %v1356_v4  }
 0x234 PF: > { %s15_s24 = sadd.s32 1, %s1758_s24   ;;  %s2090_s18 = smov %s1738_s19 }
 0x235   : > { %p12_p0 = scmp.ge.s32.totalorder %s15_s24, 6   ;;  %s2091_s19 = smov %s1843_s6 }
 0x236   : > { %s2092_s20 = smov %s1750_s22  ;;  %s2093_s21 = smov %s1754_s23 }
 0x237   : > { %s2094_s22 = smov %s2097_s25  ;;  %s2095_s23 = smov %s2101_s26 }
 0x238   :  { %14 = sbr.rel (!%p12_p0) target bundleno = 4 (0x4), region = 127 }

</bundles_post_ra>
